<compile_context>
chip_gen: v5e
topology: v5e:2x2
jax: 0.10.0
libtpu: 0.0.40
codegen_flags: <defaults>
</compile_context>

<pallas_src>
import functools
import numpy as np
import jax
import jax.numpy as jnp
from jax import lax
from jax.experimental import pallas as pl
from jax.experimental.pallas import tpu as pltpu


# ------------------------------ Pallas kernel ------------------------------

def _atss_kernel(gt_ref, pred_ref, valid_ref, kidx_ref, keep_ref, *, K):
    # Block shapes: gt [G, BT, 4], pred [4, BT, N], valid [G, BT, 1],
    #               kidx/keep [G, BT, K].  BT = images per grid step.
    g = gt_ref[...]                      # [G, BT, 4]
    p = pred_ref[...]                    # [4, BT, N]
    valid = valid_ref[...] > 0.5         # [G, BT, 1] bool

    gcx, gcy = g[:, :, 0:1], g[:, :, 1:2]          # [G, BT, 1]
    gw, gh = g[:, :, 2:3], g[:, :, 3:4]
    pcx, pcy = p[0:1], p[1:2]                      # [1, BT, N]
    pw, ph = p[2:3], p[3:4]

    # cxcywh -> xyxy
    gx1, gy1 = gcx - gw * 0.5, gcy - gh * 0.5
    gx2, gy2 = gcx + gw * 0.5, gcy + gh * 0.5
    px1, py1 = pcx - pw * 0.5, pcy - ph * 0.5
    px2, py2 = pcx + pw * 0.5, pcy + ph * 0.5

    # squared pairwise center distance [G, BT, N]; sqrt is monotonic and
    # contributes nothing to the top-K ordering, so it is dropped.
    dx = gcx - pcx
    dy = gcy - pcy
    dist2 = dx * dx + dy * dy

    # pairwise IoU [G, BT, N]; reciprocal lands on the EUP slot.
    ix1 = jnp.maximum(gx1, px1)
    iy1 = jnp.maximum(gy1, py1)
    ix2 = jnp.minimum(gx2, px2)
    iy2 = jnp.minimum(gy2, py2)
    inter = jnp.maximum(ix2 - ix1, 0.0) * jnp.maximum(iy2 - iy1, 0.0)
    area_g = (gx2 - gx1) * (gy2 - gy1)
    area_p = (px2 - px1) * (py2 - py1)
    iou = inter * pl.reciprocal(area_g + area_p - inter, approx=False)

    # prediction center inside gt box [G, BT, N]
    inside = ((gx1 <= pcx) & (pcx <= gx2) &
              (gy1 <= pcy) & (pcy <= gy2)).astype(jnp.float32)

    # pack iou (<= 1) and inside into a single value so each top-K iteration
    # needs one masked cross-lane gather instead of two.
    combined = iou + 2.0 * inside

    G, BT, N = dist2.shape
    lane = lax.broadcasted_iota(jnp.int32, (G, BT, N), 2)

    # iterative top-K smallest squared distance per gt (K small & static):
    # 3 cross-lane reductions per step (min, tie-break argmin, packed gather).
    idx_cols, iou_cols, ins_cols = [], [], []
    work = dist2
    for _ in range(K):
        mn = jnp.min(work, axis=-1, keepdims=True)                               # [G,BT,1]
        idx_k = jnp.min(jnp.where(work == mn, lane, N), axis=-1, keepdims=True)  # lowest idx on ties
        onehot = lane == idx_k
        cmb_k = jnp.sum(jnp.where(onehot, combined, 0.0), axis=-1, keepdims=True)
        ins_k = cmb_k > 1.5
        iou_k = cmb_k - 2.0 * ins_k.astype(jnp.float32)
        idx_cols.append(idx_k)
        iou_cols.append(iou_k)
        ins_cols.append(ins_k)
        work = jnp.where(onehot, jnp.inf, work)

    # threshold = mean + unbiased std over the K candidate IoUs (torch default)
    mean = sum(iou_cols) * (1.0 / K)
    var = sum((c - mean) * (c - mean) for c in iou_cols) * (1.0 / (K - 1))
    thr = mean + jnp.sqrt(var)

    # assemble [G, BT, K] outputs with lane-select writes (no lane-sparse
    # concatenates), then store each output once.
    lane_k = lax.broadcasted_iota(jnp.int32, (G, BT, K), 2)
    idx_mat = jnp.zeros((G, BT, K), jnp.int32)
    keep_mat = jnp.zeros((G, BT, K), jnp.int32)
    for kk in range(K):
        sel = lane_k == kk
        keep_k = (iou_cols[kk] >= thr) & ins_cols[kk] & valid
        idx_mat = jnp.where(sel, idx_cols[kk], idx_mat)
        keep_mat = jnp.where(sel, keep_k.astype(jnp.int32), keep_mat)

    kidx_ref[...] = idx_mat
    keep_ref[...] = keep_mat


def atss_select(pred_boxes, gt_boxes, gt_valid, k, *, batch_block=8):
    """pred_boxes [B,N,4], gt_boxes [B,G,4], gt_valid [B,G] -> (k_idx, keep) [B,G,k] int32."""
    B, N, _ = pred_boxes.shape
    _, G, _ = gt_boxes.shape
    BT = batch_block
    B_pad = ((B + BT - 1) // BT) * BT

    # SoA layouts: predictions as [4, B, N] (N on lanes), gts as [G, B, 4]
    # (batch on sublanes).  For production N these transposes should be fused
    # upstream (anchor generator / dataloader) so pred does not take an extra
    # HBM round trip before the kernel.
    pred_t = jnp.transpose(pred_boxes, (2, 0, 1))                    # [4, B, N]
    gt_t = jnp.transpose(gt_boxes, (1, 0, 2))                        # [G, B, 4]
    valid_t = jnp.transpose(gt_valid.astype(jnp.float32), (1, 0))[..., None]  # [G, B, 1]

    if B_pad != B:
        pad = B_pad - B
        pred_t = jnp.pad(pred_t, ((0, 0), (0, pad), (0, 0)), mode="edge")
        gt_t = jnp.pad(gt_t, ((0, 0), (0, pad), (0, 0)))
        valid_t = jnp.pad(valid_t, ((0, 0), (0, pad), (0, 0)))

    kernel = functools.partial(_atss_kernel, K=k)
    kidx_t, keep_t = pl.pallas_call(
        kernel,
        out_shape=(jax.ShapeDtypeStruct((G, B_pad, k), jnp.int32),
                   jax.ShapeDtypeStruct((G, B_pad, k), jnp.int32)),
        grid_spec=pltpu.PrefetchScalarGridSpec(
            num_scalar_prefetch=0,
            grid=(B_pad // BT,),
            in_specs=[pl.BlockSpec((G, BT, 4), lambda b: (0, b, 0)),
                      pl.BlockSpec((4, BT, N), lambda b: (0, b, 0)),
                      pl.BlockSpec((G, BT, 1), lambda b: (0, b, 0))],
            out_specs=(pl.BlockSpec((G, BT, k), lambda b: (0, b, 0)),
                       pl.BlockSpec((G, BT, k), lambda b: (0, b, 0)))),
        compiler_params=pltpu.CompilerParams(
            dimension_semantics=("parallel",)),
    )(gt_t, pred_t, valid_t)

    kidx = jnp.transpose(kidx_t, (1, 0, 2))[:B]   # [B, G, k]
    keep = jnp.transpose(keep_t, (1, 0, 2))[:B]   # [B, G, k]
    return kidx, keep


# ----------------------- host-side glue / verification ----------------------
# TODO(synk): the ragged Python-list output of the PyTorch forward (variable
# #matches per image, built with .item()) has no fixed-shape Pallas equivalent;
# it is extracted here on host from the fixed-shape (k_idx, keep) kernel
# outputs, preserving the exact (gt, distance-rank) iteration order.

def indices_from_kernel(k_idx, keep, num_gt):
    k_idx = np.asarray(k_idx)
    keep = np.asarray(keep)
    out = []
    for b in range(k_idx.shape[0]):
        pred_ids, gt_ids = [], []
        for i in range(num_gt[b]):
            for kk in range(k_idx.shape[2]):
                if keep[b, i, kk]:
                    pred_ids.append(int(k_idx[b, i, kk]))
                    gt_ids.append(i)
        out.append((np.asarray(pred_ids, dtype=np.int64),
                    np.asarray(gt_ids, dtype=np.int64)))
    return out


def _cxcywh_to_xyxy_np(b):
    cx, cy, w, h = b[..., 0], b[..., 1], b[..., 2], b[..., 3]
    return np.stack([cx - w / 2, cy - h / 2, cx + w / 2, cy + h / 2], axis=-1)


def _box_iou_np(a, b):
    ix1 = np.maximum(a[:, None, 0], b[None, :, 0])
    iy1 = np.maximum(a[:, None, 1], b[None, :, 1])
    ix2 = np.minimum(a[:, None, 2], b[None, :, 2])
    iy2 = np.minimum(a[:, None, 3], b[None, :, 3])
    inter = np.clip(ix2 - ix1, 0, None) * np.clip(iy2 - iy1, 0, None)
    area_a = (a[:, 2] - a[:, 0]) * (a[:, 3] - a[:, 1])
    area_b = (b[:, 2] - b[:, 0]) * (b[:, 3] - b[:, 1])
    return inter / (area_a[:, None] + area_b[None, :] - inter)


def _reference_mats(pred_np, gt_np, num_gt, K):
    # Ranking done on squared distance (same ordering as torch.cdist up to
    # sqrt-rounding ties), stable argsort tie-break = lowest index.
    B, N, _ = pred_np.shape
    G = gt_np.shape[1]
    kidx = np.zeros((B, G, K), np.int64)
    keep = np.zeros((B, G, K), bool)
    margin = np.full((B, G, K), np.inf, np.float32)
    for b in range(B):
        p = pred_np[b]
        for i in range(num_gt[b]):
            gt = gt_np[b, i]
            d2 = ((gt[:2] - p[:, :2]) ** 2).sum(-1)
            ki = np.argsort(d2, kind="stable")[:K]
            kidx[b, i] = ki
            kb = p[ki]
            gxy = _cxcywh_to_xyxy_np(gt[None])
            kxy = _cxcywh_to_xyxy_np(kb)
            ious = _box_iou_np(gxy, kxy)[0]
            thr = ious.mean() + ious.std(ddof=1)
            margin[b, i] = np.abs(ious - thr)
            x1, y1, x2, y2 = gxy[0]
            inside = ((x1 <= kb[:, 0]) & (kb[:, 0] <= x2) &
                      (y1 <= kb[:, 1]) & (kb[:, 1] <= y2))
            keep[b, i] = (ious >= thr) & inside
    return kidx, keep, margin


if __name__ == "__main__":
    B, N, G, K = 2, 128, 4, 4
    key = jax.random.PRNGKey(0)
    kp, kg = jax.random.split(key)

    # synthetic cxcywh boxes (deterministic)
    pc = jax.random.uniform(kp, (B, N, 2), jnp.float32, 0.1, 0.9)
    ps = jax.random.uniform(jax.random.fold_in(kp, 1), (B, N, 2), jnp.float32, 0.05, 0.35)
    pred = jnp.concatenate([pc, ps], axis=-1)                   # [B, N, 4]

    gc = jax.random.uniform(kg, (B, G, 2), jnp.float32, 0.2, 0.8)
    gs = jax.random.uniform(jax.random.fold_in(kg, 1), (B, G, 2), jnp.float32, 0.1, 0.4)
    gt = jnp.concatenate([gc, gs], axis=-1)                     # [B, G, 4]

    num_gt = [4, 2]                                             # second image has padded gt rows
    valid = jnp.array([[1.0, 1.0, 1.0, 1.0],
                       [1.0, 1.0, 0.0, 0.0]], jnp.float32)

    k_idx, keep = atss_select(pred, gt, valid, K)
    jax.block_until_ready((k_idx, keep))

    # --- verify against a numpy re-implementation of the PyTorch forward ---
    pred_np = np.asarray(pred)
    gt_np = np.asarray(gt)
    kidx_ref, keep_ref, margin = _reference_mats(pred_np, gt_np, num_gt, K)
    kidx_np = np.asarray(k_idx)
    keep_np = np.asarray(keep).astype(bool)

    for b in range(B):
        assert np.array_equal(kidx_np[b, :num_gt[b]], kidx_ref[b, :num_gt[b]]), "top-k mismatch"
        mism = keep_np[b, :num_gt[b]] != keep_ref[b, :num_gt[b]]
        # forgive only boundary cases where iou ~= threshold (fp32 order-of-ops)
        assert np.all(~mism | (margin[b, :num_gt[b]] < 1e-4)), "keep-mask mismatch"
        assert not keep_np[b, num_gt[b]:].any(), "padding rows must not match"

    matches = indices_from_kernel(k_idx, keep, num_gt)  # list[(pred_idx int64, gt_idx int64)]
    assert len(matches) == B

    print("KERNEL_OK")
</pallas_src>

<mosaic_0001>
module attributes {stable_mosaic.version = 11 : i64} {
  func.func @_atss_kernel(%arg0: i32, %arg1: memref<4x8x4xf32, #tpu.memory_space<vmem>>, %arg2: memref<4x8x128xf32, #tpu.memory_space<vmem>>, %arg3: memref<4x8x1xf32, #tpu.memory_space<vmem>>, %arg4: memref<4x8x4xi32, #tpu.memory_space<vmem>>, %arg5: memref<4x8x4xi32, #tpu.memory_space<vmem>>) attributes {dimension_semantics = [#tpu.dimension_semantics<parallel>], iteration_bounds = array<i64: 1>, scalar_prefetch = 0 : i64, scratch_operands = 0 : i64, tpu.core_type = #tpu.core_type<tc>, window_params = [{transform_indices = @transform_0, window_bounds = array<i64: 4, 8, 4>}, {transform_indices = @transform_1, window_bounds = array<i64: 4, 8, 128>}, {transform_indices = @transform_2, window_bounds = array<i64: 4, 8, 1>}, {transform_indices = @transform_3, window_bounds = array<i64: 4, 8, 4>}, {transform_indices = @transform_4, window_bounds = array<i64: 4, 8, 4>}]} {
    %c0 = arith.constant 0 : index
    %c0_0 = arith.constant 0 : index
    %c0_1 = arith.constant 0 : index
    %0 = vector.load %arg1[%c0, %c0_0, %c0_1] : memref<4x8x4xf32, #tpu.memory_space<vmem>>, vector<4x8x4xf32>
    %c0_2 = arith.constant 0 : index
    %c0_3 = arith.constant 0 : index
    %c0_4 = arith.constant 0 : index
    %1 = vector.load %arg2[%c0_2, %c0_3, %c0_4] : memref<4x8x128xf32, #tpu.memory_space<vmem>>, vector<4x8x128xf32>
    %c0_5 = arith.constant 0 : index
    %c0_6 = arith.constant 0 : index
    %c0_7 = arith.constant 0 : index
    %2 = vector.load %arg3[%c0_5, %c0_6, %c0_7] : memref<4x8x1xf32, #tpu.memory_space<vmem>>, vector<4x8x1xf32>
    %cst = arith.constant 5.000000e-01 : f32
    %3 = vector.broadcast %cst : f32 to vector<4x8x1xf32>
    %4 = arith.cmpf ogt, %2, %3 : vector<4x8x1xf32>
    %5 = vector.extract_strided_slice %0 {offsets = [0, 0, 0], sizes = [4, 8, 1], strides = [1, 1, 1]} : vector<4x8x4xf32> to vector<4x8x1xf32>
    %6 = vector.extract_strided_slice %0 {offsets = [0, 0, 1], sizes = [4, 8, 1], strides = [1, 1, 1]} : vector<4x8x4xf32> to vector<4x8x1xf32>
    %7 = vector.extract_strided_slice %0 {offsets = [0, 0, 2], sizes = [4, 8, 1], strides = [1, 1, 1]} : vector<4x8x4xf32> to vector<4x8x1xf32>
    %8 = vector.extract_strided_slice %0 {offsets = [0, 0, 3], sizes = [4, 8, 1], strides = [1, 1, 1]} : vector<4x8x4xf32> to vector<4x8x1xf32>
    %9 = vector.extract_strided_slice %1 {offsets = [0, 0, 0], sizes = [1, 8, 128], strides = [1, 1, 1]} : vector<4x8x128xf32> to vector<1x8x128xf32>
    %10 = vector.extract_strided_slice %1 {offsets = [1, 0, 0], sizes = [1, 8, 128], strides = [1, 1, 1]} : vector<4x8x128xf32> to vector<1x8x128xf32>
    %11 = vector.extract_strided_slice %1 {offsets = [2, 0, 0], sizes = [1, 8, 128], strides = [1, 1, 1]} : vector<4x8x128xf32> to vector<1x8x128xf32>
    %12 = vector.extract_strided_slice %1 {offsets = [3, 0, 0], sizes = [1, 8, 128], strides = [1, 1, 1]} : vector<4x8x128xf32> to vector<1x8x128xf32>
    %cst_8 = arith.constant 5.000000e-01 : f32
    %13 = vector.broadcast %cst_8 : f32 to vector<4x8x1xf32>
    %14 = arith.mulf %7, %13 : vector<4x8x1xf32>
    %15 = arith.subf %5, %14 : vector<4x8x1xf32>
    %cst_9 = arith.constant 5.000000e-01 : f32
    %16 = vector.broadcast %cst_9 : f32 to vector<4x8x1xf32>
    %17 = arith.mulf %8, %16 : vector<4x8x1xf32>
    %18 = arith.subf %6, %17 : vector<4x8x1xf32>
    %cst_10 = arith.constant 5.000000e-01 : f32
    %19 = vector.broadcast %cst_10 : f32 to vector<4x8x1xf32>
    %20 = arith.mulf %7, %19 : vector<4x8x1xf32>
    %21 = arith.addf %5, %20 : vector<4x8x1xf32>
    %cst_11 = arith.constant 5.000000e-01 : f32
    %22 = vector.broadcast %cst_11 : f32 to vector<4x8x1xf32>
    %23 = arith.mulf %8, %22 : vector<4x8x1xf32>
    %24 = arith.addf %6, %23 : vector<4x8x1xf32>
    %cst_12 = arith.constant 5.000000e-01 : f32
    %25 = vector.broadcast %cst_12 : f32 to vector<1x8x128xf32>
    %26 = arith.mulf %11, %25 : vector<1x8x128xf32>
    %27 = arith.subf %9, %26 : vector<1x8x128xf32>
    %cst_13 = arith.constant 5.000000e-01 : f32
    %28 = vector.broadcast %cst_13 : f32 to vector<1x8x128xf32>
    %29 = arith.mulf %12, %28 : vector<1x8x128xf32>
    %30 = arith.subf %10, %29 : vector<1x8x128xf32>
    %cst_14 = arith.constant 5.000000e-01 : f32
    %31 = vector.broadcast %cst_14 : f32 to vector<1x8x128xf32>
    %32 = arith.mulf %11, %31 : vector<1x8x128xf32>
    %33 = arith.addf %9, %32 : vector<1x8x128xf32>
    %cst_15 = arith.constant 5.000000e-01 : f32
    %34 = vector.broadcast %cst_15 : f32 to vector<1x8x128xf32>
    %35 = arith.mulf %12, %34 : vector<1x8x128xf32>
    %36 = arith.addf %10, %35 : vector<1x8x128xf32>
    %37 = vector.broadcast %5 : vector<4x8x1xf32> to vector<4x8x128xf32>
    %38 = vector.broadcast %9 : vector<1x8x128xf32> to vector<4x8x128xf32>
    %39 = arith.subf %37, %38 : vector<4x8x128xf32>
    %40 = vector.broadcast %6 : vector<4x8x1xf32> to vector<4x8x128xf32>
    %41 = vector.broadcast %10 : vector<1x8x128xf32> to vector<4x8x128xf32>
    %42 = arith.subf %40, %41 : vector<4x8x128xf32>
    %43 = arith.mulf %39, %39 : vector<4x8x128xf32>
    %44 = arith.mulf %42, %42 : vector<4x8x128xf32>
    %45 = arith.addf %43, %44 : vector<4x8x128xf32>
    %46 = vector.broadcast %15 : vector<4x8x1xf32> to vector<4x8x128xf32>
    %47 = vector.broadcast %27 : vector<1x8x128xf32> to vector<4x8x128xf32>
    %48 = arith.maximumf %46, %47 : vector<4x8x128xf32>
    %49 = vector.broadcast %18 : vector<4x8x1xf32> to vector<4x8x128xf32>
    %50 = vector.broadcast %30 : vector<1x8x128xf32> to vector<4x8x128xf32>
    %51 = arith.maximumf %49, %50 : vector<4x8x128xf32>
    %52 = vector.broadcast %21 : vector<4x8x1xf32> to vector<4x8x128xf32>
    %53 = vector.broadcast %33 : vector<1x8x128xf32> to vector<4x8x128xf32>
    %54 = arith.minimumf %52, %53 : vector<4x8x128xf32>
    %55 = vector.broadcast %24 : vector<4x8x1xf32> to vector<4x8x128xf32>
    %56 = vector.broadcast %36 : vector<1x8x128xf32> to vector<4x8x128xf32>
    %57 = arith.minimumf %55, %56 : vector<4x8x128xf32>
    %58 = arith.subf %54, %48 : vector<4x8x128xf32>
    %cst_16 = arith.constant 0.000000e+00 : f32
    %59 = vector.broadcast %cst_16 : f32 to vector<4x8x128xf32>
    %60 = arith.maximumf %58, %59 : vector<4x8x128xf32>
    %61 = arith.subf %57, %51 : vector<4x8x128xf32>
    %cst_17 = arith.constant 0.000000e+00 : f32
    %62 = vector.broadcast %cst_17 : f32 to vector<4x8x128xf32>
    %63 = arith.maximumf %61, %62 : vector<4x8x128xf32>
    %64 = arith.mulf %60, %63 : vector<4x8x128xf32>
    %65 = arith.subf %21, %15 : vector<4x8x1xf32>
    %66 = arith.subf %24, %18 : vector<4x8x1xf32>
    %67 = arith.mulf %65, %66 : vector<4x8x1xf32>
    %68 = arith.subf %33, %27 : vector<1x8x128xf32>
    %69 = arith.subf %36, %30 : vector<1x8x128xf32>
    %70 = arith.mulf %68, %69 : vector<1x8x128xf32>
    %71 = vector.broadcast %67 : vector<4x8x1xf32> to vector<4x8x128xf32>
    %72 = vector.broadcast %70 : vector<1x8x128xf32> to vector<4x8x128xf32>
    %73 = arith.addf %71, %72 : vector<4x8x128xf32>
    %74 = arith.subf %73, %64 : vector<4x8x128xf32>
    %75 = tpu.reciprocal %74 : vector<4x8x128xf32> -> vector<4x8x128xf32>
    %76 = arith.mulf %64, %75 : vector<4x8x128xf32>
    %77 = vector.broadcast %15 : vector<4x8x1xf32> to vector<4x8x128xf32>
    %78 = vector.broadcast %9 : vector<1x8x128xf32> to vector<4x8x128xf32>
    %79 = arith.cmpf ole, %77, %78 : vector<4x8x128xf32>
    %80 = vector.broadcast %9 : vector<1x8x128xf32> to vector<4x8x128xf32>
    %81 = vector.broadcast %21 : vector<4x8x1xf32> to vector<4x8x128xf32>
    %82 = arith.cmpf ole, %80, %81 : vector<4x8x128xf32>
    %83 = arith.andi %79, %82 : vector<4x8x128xi1>
    %84 = vector.broadcast %18 : vector<4x8x1xf32> to vector<4x8x128xf32>
    %85 = vector.broadcast %10 : vector<1x8x128xf32> to vector<4x8x128xf32>
    %86 = arith.cmpf ole, %84, %85 : vector<4x8x128xf32>
    %87 = arith.andi %83, %86 : vector<4x8x128xi1>
    %88 = vector.broadcast %10 : vector<1x8x128xf32> to vector<4x8x128xf32>
    %89 = vector.broadcast %24 : vector<4x8x1xf32> to vector<4x8x128xf32>
    %90 = arith.cmpf ole, %88, %89 : vector<4x8x128xf32>
    %91 = arith.andi %87, %90 : vector<4x8x128xi1>
    %92 = arith.extui %91 : vector<4x8x128xi1> to vector<4x8x128xi32>
    %93 = arith.sitofp %92 : vector<4x8x128xi32> to vector<4x8x128xf32>
    %cst_18 = arith.constant 2.000000e+00 : f32
    %94 = vector.broadcast %cst_18 : f32 to vector<4x8x128xf32>
    %95 = arith.mulf %94, %93 : vector<4x8x128xf32>
    %96 = arith.addf %76, %95 : vector<4x8x128xf32>
    %97 = tpu.iota {dimensions = array<i32: 2>} : vector<4x8x128xi32>
    %cst_19 = arith.constant dense<0x7F800000> : vector<4x8xf32>
    %98 = vector.multi_reduction <minimumf>, %45, %cst_19 [2] : vector<4x8x128xf32> to vector<4x8xf32>
    %99 = vector.shape_cast %98 : vector<4x8xf32> to vector<4x8x1xf32>
    %100 = vector.broadcast %99 : vector<4x8x1xf32> to vector<4x8x128xf32>
    %101 = arith.cmpf oeq, %45, %100 : vector<4x8x128xf32>
    %c128_i32 = arith.constant 128 : i32
    %102 = vector.broadcast %c128_i32 : i32 to vector<4x8x128xi32>
    %103 = arith.select %101, %97, %102 : vector<4x8x128xi1>, vector<4x8x128xi32>
    %cst_20 = arith.constant dense<2147483647> : vector<4x8xi32>
    %104 = vector.multi_reduction <minsi>, %103, %cst_20 [2] : vector<4x8x128xi32> to vector<4x8xi32>
    %105 = vector.shape_cast %104 : vector<4x8xi32> to vector<4x8x1xi32>
    %106 = vector.broadcast %105 : vector<4x8x1xi32> to vector<4x8x128xi32>
    %107 = arith.cmpi eq, %97, %106 : vector<4x8x128xi32>
    %cst_21 = arith.constant 0.000000e+00 : f32
    %108 = vector.broadcast %cst_21 : f32 to vector<4x8x128xf32>
    %109 = arith.select %107, %96, %108 : vector<4x8x128xi1>, vector<4x8x128xf32>
    %cst_22 = arith.constant dense<0.000000e+00> : vector<4x8xf32>
    %110 = vector.multi_reduction <add>, %109, %cst_22 [2] : vector<4x8x128xf32> to vector<4x8xf32>
    %111 = vector.shape_cast %110 : vector<4x8xf32> to vector<4x8x1xf32>
    %cst_23 = arith.constant 1.500000e+00 : f32
    %112 = vector.broadcast %cst_23 : f32 to vector<4x8x1xf32>
    %113 = arith.cmpf ogt, %111, %112 : vector<4x8x1xf32>
    %114 = arith.extui %113 : vector<4x8x1xi1> to vector<4x8x1xi32>
    %115 = arith.sitofp %114 : vector<4x8x1xi32> to vector<4x8x1xf32>
    %cst_24 = arith.constant 2.000000e+00 : f32
    %116 = vector.broadcast %cst_24 : f32 to vector<4x8x1xf32>
    %117 = arith.mulf %116, %115 : vector<4x8x1xf32>
    %118 = arith.subf %111, %117 : vector<4x8x1xf32>
    %cst_25 = arith.constant 0x7F800000 : f32
    %119 = vector.broadcast %cst_25 : f32 to vector<4x8x128xf32>
    %120 = arith.select %107, %119, %45 : vector<4x8x128xi1>, vector<4x8x128xf32>
    %cst_26 = arith.constant dense<0x7F800000> : vector<4x8xf32>
    %121 = vector.multi_reduction <minimumf>, %120, %cst_26 [2] : vector<4x8x128xf32> to vector<4x8xf32>
    %122 = vector.shape_cast %121 : vector<4x8xf32> to vector<4x8x1xf32>
    %123 = vector.broadcast %122 : vector<4x8x1xf32> to vector<4x8x128xf32>
    %124 = arith.cmpf oeq, %120, %123 : vector<4x8x128xf32>
    %c128_i32_27 = arith.constant 128 : i32
    %125 = vector.broadcast %c128_i32_27 : i32 to vector<4x8x128xi32>
    %126 = arith.select %124, %97, %125 : vector<4x8x128xi1>, vector<4x8x128xi32>
    %cst_28 = arith.constant dense<2147483647> : vector<4x8xi32>
    %127 = vector.multi_reduction <minsi>, %126, %cst_28 [2] : vector<4x8x128xi32> to vector<4x8xi32>
    %128 = vector.shape_cast %127 : vector<4x8xi32> to vector<4x8x1xi32>
    %129 = vector.broadcast %128 : vector<4x8x1xi32> to vector<4x8x128xi32>
    %130 = arith.cmpi eq, %97, %129 : vector<4x8x128xi32>
    %cst_29 = arith.constant 0.000000e+00 : f32
    %131 = vector.broadcast %cst_29 : f32 to vector<4x8x128xf32>
    %132 = arith.select %130, %96, %131 : vector<4x8x128xi1>, vector<4x8x128xf32>
    %cst_30 = arith.constant dense<0.000000e+00> : vector<4x8xf32>
    %133 = vector.multi_reduction <add>, %132, %cst_30 [2] : vector<4x8x128xf32> to vector<4x8xf32>
    %134 = vector.shape_cast %133 : vector<4x8xf32> to vector<4x8x1xf32>
    %cst_31 = arith.constant 1.500000e+00 : f32
    %135 = vector.broadcast %cst_31 : f32 to vector<4x8x1xf32>
    %136 = arith.cmpf ogt, %134, %135 : vector<4x8x1xf32>
    %137 = arith.extui %136 : vector<4x8x1xi1> to vector<4x8x1xi32>
    %138 = arith.sitofp %137 : vector<4x8x1xi32> to vector<4x8x1xf32>
    %cst_32 = arith.constant 2.000000e+00 : f32
    %139 = vector.broadcast %cst_32 : f32 to vector<4x8x1xf32>
    %140 = arith.mulf %139, %138 : vector<4x8x1xf32>
    %141 = arith.subf %134, %140 : vector<4x8x1xf32>
    %cst_33 = arith.constant 0x7F800000 : f32
    %142 = vector.broadcast %cst_33 : f32 to vector<4x8x128xf32>
    %143 = arith.select %130, %142, %120 : vector<4x8x128xi1>, vector<4x8x128xf32>
    %cst_34 = arith.constant dense<0x7F800000> : vector<4x8xf32>
    %144 = vector.multi_reduction <minimumf>, %143, %cst_34 [2] : vector<4x8x128xf32> to vector<4x8xf32>
    %145 = vector.shape_cast %144 : vector<4x8xf32> to vector<4x8x1xf32>
    %146 = vector.broadcast %145 : vector<4x8x1xf32> to vector<4x8x128xf32>
    %147 = arith.cmpf oeq, %143, %146 : vector<4x8x128xf32>
    %c128_i32_35 = arith.constant 128 : i32
    %148 = vector.broadcast %c128_i32_35 : i32 to vector<4x8x128xi32>
    %149 = arith.select %147, %97, %148 : vector<4x8x128xi1>, vector<4x8x128xi32>
    %cst_36 = arith.constant dense<2147483647> : vector<4x8xi32>
    %150 = vector.multi_reduction <minsi>, %149, %cst_36 [2] : vector<4x8x128xi32> to vector<4x8xi32>
    %151 = vector.shape_cast %150 : vector<4x8xi32> to vector<4x8x1xi32>
    %152 = vector.broadcast %151 : vector<4x8x1xi32> to vector<4x8x128xi32>
    %153 = arith.cmpi eq, %97, %152 : vector<4x8x128xi32>
    %cst_37 = arith.constant 0.000000e+00 : f32
    %154 = vector.broadcast %cst_37 : f32 to vector<4x8x128xf32>
    %155 = arith.select %153, %96, %154 : vector<4x8x128xi1>, vector<4x8x128xf32>
    %cst_38 = arith.constant dense<0.000000e+00> : vector<4x8xf32>
    %156 = vector.multi_reduction <add>, %155, %cst_38 [2] : vector<4x8x128xf32> to vector<4x8xf32>
    %157 = vector.shape_cast %156 : vector<4x8xf32> to vector<4x8x1xf32>
    %cst_39 = arith.constant 1.500000e+00 : f32
    %158 = vector.broadcast %cst_39 : f32 to vector<4x8x1xf32>
    %159 = arith.cmpf ogt, %157, %158 : vector<4x8x1xf32>
    %160 = arith.extui %159 : vector<4x8x1xi1> to vector<4x8x1xi32>
    %161 = arith.sitofp %160 : vector<4x8x1xi32> to vector<4x8x1xf32>
    %cst_40 = arith.constant 2.000000e+00 : f32
    %162 = vector.broadcast %cst_40 : f32 to vector<4x8x1xf32>
    %163 = arith.mulf %162, %161 : vector<4x8x1xf32>
    %164 = arith.subf %157, %163 : vector<4x8x1xf32>
    %cst_41 = arith.constant 0x7F800000 : f32
    %165 = vector.broadcast %cst_41 : f32 to vector<4x8x128xf32>
    %166 = arith.select %153, %165, %143 : vector<4x8x128xi1>, vector<4x8x128xf32>
    %cst_42 = arith.constant dense<0x7F800000> : vector<4x8xf32>
    %167 = vector.multi_reduction <minimumf>, %166, %cst_42 [2] : vector<4x8x128xf32> to vector<4x8xf32>
    %168 = vector.shape_cast %167 : vector<4x8xf32> to vector<4x8x1xf32>
    %169 = vector.broadcast %168 : vector<4x8x1xf32> to vector<4x8x128xf32>
    %170 = arith.cmpf oeq, %166, %169 : vector<4x8x128xf32>
    %c128_i32_43 = arith.constant 128 : i32
    %171 = vector.broadcast %c128_i32_43 : i32 to vector<4x8x128xi32>
    %172 = arith.select %170, %97, %171 : vector<4x8x128xi1>, vector<4x8x128xi32>
    %cst_44 = arith.constant dense<2147483647> : vector<4x8xi32>
    %173 = vector.multi_reduction <minsi>, %172, %cst_44 [2] : vector<4x8x128xi32> to vector<4x8xi32>
    %174 = vector.shape_cast %173 : vector<4x8xi32> to vector<4x8x1xi32>
    %175 = vector.broadcast %174 : vector<4x8x1xi32> to vector<4x8x128xi32>
    %176 = arith.cmpi eq, %97, %175 : vector<4x8x128xi32>
    %cst_45 = arith.constant 0.000000e+00 : f32
    %177 = vector.broadcast %cst_45 : f32 to vector<4x8x128xf32>
    %178 = arith.select %176, %96, %177 : vector<4x8x128xi1>, vector<4x8x128xf32>
    %cst_46 = arith.constant dense<0.000000e+00> : vector<4x8xf32>
    %179 = vector.multi_reduction <add>, %178, %cst_46 [2] : vector<4x8x128xf32> to vector<4x8xf32>
    %180 = vector.shape_cast %179 : vector<4x8xf32> to vector<4x8x1xf32>
    %cst_47 = arith.constant 1.500000e+00 : f32
    %181 = vector.broadcast %cst_47 : f32 to vector<4x8x1xf32>
    %182 = arith.cmpf ogt, %180, %181 : vector<4x8x1xf32>
    %183 = arith.extui %182 : vector<4x8x1xi1> to vector<4x8x1xi32>
    %184 = arith.sitofp %183 : vector<4x8x1xi32> to vector<4x8x1xf32>
    %cst_48 = arith.constant 2.000000e+00 : f32
    %185 = vector.broadcast %cst_48 : f32 to vector<4x8x1xf32>
    %186 = arith.mulf %185, %184 : vector<4x8x1xf32>
    %187 = arith.subf %180, %186 : vector<4x8x1xf32>
    %cst_49 = arith.constant 0.000000e+00 : f32
    %188 = vector.broadcast %cst_49 : f32 to vector<4x8x1xf32>
    %189 = arith.addf %188, %118 : vector<4x8x1xf32>
    %190 = arith.addf %189, %141 : vector<4x8x1xf32>
    %191 = arith.addf %190, %164 : vector<4x8x1xf32>
    %192 = arith.addf %191, %187 : vector<4x8x1xf32>
    %cst_50 = arith.constant 2.500000e-01 : f32
    %193 = vector.broadcast %cst_50 : f32 to vector<4x8x1xf32>
    %194 = arith.mulf %192, %193 : vector<4x8x1xf32>
    %195 = arith.subf %118, %194 : vector<4x8x1xf32>
    %196 = arith.subf %118, %194 : vector<4x8x1xf32>
    %197 = arith.mulf %195, %196 : vector<4x8x1xf32>
    %cst_51 = arith.constant 0.000000e+00 : f32
    %198 = vector.broadcast %cst_51 : f32 to vector<4x8x1xf32>
    %199 = arith.addf %198, %197 : vector<4x8x1xf32>
    %200 = arith.subf %141, %194 : vector<4x8x1xf32>
    %201 = arith.subf %141, %194 : vector<4x8x1xf32>
    %202 = arith.mulf %200, %201 : vector<4x8x1xf32>
    %203 = arith.addf %199, %202 : vector<4x8x1xf32>
    %204 = arith.subf %164, %194 : vector<4x8x1xf32>
    %205 = arith.subf %164, %194 : vector<4x8x1xf32>
    %206 = arith.mulf %204, %205 : vector<4x8x1xf32>
    %207 = arith.addf %203, %206 : vector<4x8x1xf32>
    %208 = arith.subf %187, %194 : vector<4x8x1xf32>
    %209 = arith.subf %187, %194 : vector<4x8x1xf32>
    %210 = arith.mulf %208, %209 : vector<4x8x1xf32>
    %211 = arith.addf %207, %210 : vector<4x8x1xf32>
    %cst_52 = arith.constant 0.333333343 : f32
    %212 = vector.broadcast %cst_52 : f32 to vector<4x8x1xf32>
    %213 = arith.mulf %211, %212 : vector<4x8x1xf32>
    %214 = math.sqrt %213 : vector<4x8x1xf32>
    %215 = arith.addf %194, %214 : vector<4x8x1xf32>
    %216 = tpu.iota {dimensions = array<i32: 2>} : vector<4x8x4xi32>
    %c0_i32 = arith.constant 0 : i32
    %217 = vector.broadcast %c0_i32 : i32 to vector<4x8x4xi32>
    %c0_i32_53 = arith.constant 0 : i32
    %218 = vector.broadcast %c0_i32_53 : i32 to vector<4x8x4xi32>
    %c0_i32_54 = arith.constant 0 : i32
    %219 = vector.broadcast %c0_i32_54 : i32 to vector<4x8x4xi32>
    %220 = arith.cmpi eq, %216, %219 : vector<4x8x4xi32>
    %221 = arith.cmpf oge, %118, %215 : vector<4x8x1xf32>
    %222 = arith.andi %221, %113 : vector<4x8x1xi1>
    %223 = arith.andi %222, %4 : vector<4x8x1xi1>
    %224 = vector.shape_cast %105 : vector<4x8x1xi32> to vector<4x8x1xi32>
    %225 = vector.broadcast %224 : vector<4x8x1xi32> to vector<4x8x4xi32>
    %226 = arith.select %220, %225, %217 : vector<4x8x4xi1>, vector<4x8x4xi32>
    %227 = arith.extui %223 : vector<4x8x1xi1> to vector<4x8x1xi32>
    %228 = vector.shape_cast %227 : vector<4x8x1xi32> to vector<4x8x1xi32>
    %229 = vector.broadcast %228 : vector<4x8x1xi32> to vector<4x8x4xi32>
    %230 = arith.select %220, %229, %218 : vector<4x8x4xi1>, vector<4x8x4xi32>
    %c1_i32 = arith.constant 1 : i32
    %231 = vector.broadcast %c1_i32 : i32 to vector<4x8x4xi32>
    %232 = arith.cmpi eq, %216, %231 : vector<4x8x4xi32>
    %233 = arith.cmpf oge, %141, %215 : vector<4x8x1xf32>
    %234 = arith.andi %233, %136 : vector<4x8x1xi1>
    %235 = arith.andi %234, %4 : vector<4x8x1xi1>
    %236 = vector.shape_cast %128 : vector<4x8x1xi32> to vector<4x8x1xi32>
    %237 = vector.broadcast %236 : vector<4x8x1xi32> to vector<4x8x4xi32>
    %238 = arith.select %232, %237, %226 : vector<4x8x4xi1>, vector<4x8x4xi32>
    %239 = arith.extui %235 : vector<4x8x1xi1> to vector<4x8x1xi32>
    %240 = vector.shape_cast %239 : vector<4x8x1xi32> to vector<4x8x1xi32>
    %241 = vector.broadcast %240 : vector<4x8x1xi32> to vector<4x8x4xi32>
    %242 = arith.select %232, %241, %230 : vector<4x8x4xi1>, vector<4x8x4xi32>
    %c2_i32 = arith.constant 2 : i32
    %243 = vector.broadcast %c2_i32 : i32 to vector<4x8x4xi32>
    %244 = arith.cmpi eq, %216, %243 : vector<4x8x4xi32>
    %245 = arith.cmpf oge, %164, %215 : vector<4x8x1xf32>
    %246 = arith.andi %245, %159 : vector<4x8x1xi1>
    %247 = arith.andi %246, %4 : vector<4x8x1xi1>
    %248 = vector.shape_cast %151 : vector<4x8x1xi32> to vector<4x8x1xi32>
    %249 = vector.broadcast %248 : vector<4x8x1xi32> to vector<4x8x4xi32>
    %250 = arith.select %244, %249, %238 : vector<4x8x4xi1>, vector<4x8x4xi32>
    %251 = arith.extui %247 : vector<4x8x1xi1> to vector<4x8x1xi32>
    %252 = vector.shape_cast %251 : vector<4x8x1xi32> to vector<4x8x1xi32>
    %253 = vector.broadcast %252 : vector<4x8x1xi32> to vector<4x8x4xi32>
    %254 = arith.select %244, %253, %242 : vector<4x8x4xi1>, vector<4x8x4xi32>
    %c3_i32 = arith.constant 3 : i32
    %255 = vector.broadcast %c3_i32 : i32 to vector<4x8x4xi32>
    %256 = arith.cmpi eq, %216, %255 : vector<4x8x4xi32>
    %257 = arith.cmpf oge, %187, %215 : vector<4x8x1xf32>
    %258 = arith.andi %257, %182 : vector<4x8x1xi1>
    %259 = arith.andi %258, %4 : vector<4x8x1xi1>
    %260 = vector.shape_cast %174 : vector<4x8x1xi32> to vector<4x8x1xi32>
    %261 = vector.broadcast %260 : vector<4x8x1xi32> to vector<4x8x4xi32>
    %262 = arith.select %256, %261, %250 : vector<4x8x4xi1>, vector<4x8x4xi32>
    %263 = arith.extui %259 : vector<4x8x1xi1> to vector<4x8x1xi32>
    %264 = vector.shape_cast %263 : vector<4x8x1xi32> to vector<4x8x1xi32>
    %265 = vector.broadcast %264 : vector<4x8x1xi32> to vector<4x8x4xi32>
    %266 = arith.select %256, %265, %254 : vector<4x8x4xi1>, vector<4x8x4xi32>
    %c0_55 = arith.constant 0 : index
    %c0_56 = arith.constant 0 : index
    %c0_57 = arith.constant 0 : index
    %267 = vector.load %arg4[%c0_55, %c0_56, %c0_57] : memref<4x8x4xi32, #tpu.memory_space<vmem>>, vector<4x8x4xi32>
    tpu.vector_store %arg4[%c0_55, %c0_56, %c0_57], %262 {strides = array<i32>} : memref<4x8x4xi32, #tpu.memory_space<vmem>>, vector<4x8x4xi32>,
    %c0_58 = arith.constant 0 : index
    %c0_59 = arith.constant 0 : index
    %c0_60 = arith.constant 0 : index
    %268 = vector.load %arg5[%c0_58, %c0_59, %c0_60] : memref<4x8x4xi32, #tpu.memory_space<vmem>>, vector<4x8x4xi32>
    tpu.vector_store %arg5[%c0_58, %c0_59, %c0_60], %266 {strides = array<i32>} : memref<4x8x4xi32, #tpu.memory_space<vmem>>, vector<4x8x4xi32>,
    return
  }
  func.func @transform_0(%arg0: i32) -> (i32, i32, i32) {
    %c0_i32 = arith.constant 0 : i32
    %c0_i32_0 = arith.constant 0 : i32
    %c0_i32_1 = arith.constant 0 : i32
    return %c0_i32, %arg0, %c0_i32_0 : i32, i32, i32
  }
  func.func @transform_1(%arg0: i32) -> (i32, i32, i32) {
    %c0_i32 = arith.constant 0 : i32
    %c0_i32_0 = arith.constant 0 : i32
    %c0_i32_1 = arith.constant 0 : i32
    return %c0_i32, %arg0, %c0_i32_0 : i32, i32, i32
  }
  func.func @transform_2(%arg0: i32) -> (i32, i32, i32) {
    %c0_i32 = arith.constant 0 : i32
    %c0_i32_0 = arith.constant 0 : i32
    %c0_i32_1 = arith.constant 0 : i32
    return %c0_i32, %arg0, %c0_i32_0 : i32, i32, i32
  }
  func.func @transform_3(%arg0: i32) -> (i32, i32, i32) {
    %c0_i32 = arith.constant 0 : i32
    %c0_i32_0 = arith.constant 0 : i32
    %c0_i32_1 = arith.constant 0 : i32
    return %c0_i32, %arg0, %c0_i32_0 : i32, i32, i32
  }
  func.func @transform_4(%arg0: i32) -> (i32, i32, i32) {
    %c0_i32 = arith.constant 0 : i32
    %c0_i32_0 = arith.constant 0 : i32
    %c0_i32_1 = arith.constant 0 : i32
    return %c0_i32, %arg0, %c0_i32_0 : i32, i32, i32
  }
}

</mosaic_0001>

<bundles_post_ra>
// kernel: tpu_custom_call.1
= control target key start
LH: loop header
LB: loop body
LE: loop exit
PB: predicated region body
PF: predicated region fallthrough
CT: control target
= control target key end

     0   :  { %v2314_v0 = vmov 0   ;;  %v1183_v3 = vmov 1   ;;  %s1184_s26 = smov 126   ;;  %v389_v38 = vlaneseq  ;;  %s1185_s27 = smov 127   ;;  %s2303_s0 = inlined_call_operand.vmem [shape: f32[4,8,4], index: 0, kind: input, shape index: {}]   ;;  %s2304_s1 = inlined_call_operand.vmem [shape: f32[4,8,128], index: 1, kind: input, shape index: {}]   ;;  %s2305_s3 = inlined_call_operand.vmem [shape: s32[4,8,4], index: 3, kind: output, shape index: {0}]   ;;  %s2306_s2 = inlined_call_operand.vmem [shape: f32[4,8,1], index: 2, kind: input, shape index: {}]   ;;  %s2307_s4 = inlined_call_operand.vmem [shape: s32[4,8,4], index: 4, kind: output, shape index: {1}]  }
   0x1   :  { %1150 = vset.pattern.permute.xlu1 %v2314_v0  ;;  %1149 = vset.pattern.permute.xlu0 %v2314_v0  ;;  %v1217_v1 = vld [vmem:[%s2303_s0 + $0x10] sm:$0xff]  ;;  %v1222_v2 = vld [vmem:[%s2303_s0] sm:$0xff]  ;;  %v1231_v4 = vld [vmem:[%s2303_s0 + $0x18] sm:$0xff] }
   0x2   :  { %78 = vperm.xlu1 %1150, %v1217_v1   ;;  %68 = vperm.xlu0 %1149, %v1222_v2   ;;  %v1236_v5 = vld [vmem:[%s2303_s0 + $0x8] sm:$0xff]  ;;  %v1256_v9 = vld [vmem:[%s2304_s1] sm:$0xff]  ;;  %v32_v37 = vmul.f32 0.5, %v1222_v2  ;;  %v1281_v39 = vand.u32 127, %v389_v38 }
   0x3   :  { %1151 = vset.pattern.permute.xlu2 %v1183_v3  ;;  %v1250_v6 = vld [vmem:[%s2304_s1 + $0x8] sm:$0xff]  ;;  %v33_v36 = vmul.f32 0.5, %v1236_v5 }
   0x4   :  { %91 = vperm.xlu2 %1151, %v1222_v2  }
   0xa   :  { %83 = vperm.xlu1 %1150, %v1231_v4   ;;  %73 = vperm.xlu0 %1149, %v1236_v5  }
   0xc   :  { %95 = vperm.xlu2 %1151, %v1236_v5  }
  0x12   :  { %1153 = vset.pattern.permute.xlu1 %v1183_v3  ;;  %1152 = vset.pattern.permute.xlu0 %v1183_v3 }
  0x13   :  { %103 = vperm.xlu1 %1153, %v1231_v4   ;;  %99 = vperm.xlu0 %1152, %v1217_v1  }
  0x14   :  { %1154 = vset.pattern.permute.xlu2 %v2314_v0 }
  0x1b   :  { %1155 = vset.pattern.permute.xlu1 %v2314_v0 }
  0x5e   :  { %v92_v7 = vpop.permute.xlu2 %91 }
  0x5f   :  { %v106_v8 = vsub.f32 %v92_v7, %v1250_v6 }
  0x61   :  { %v114_v12 = vmul.f32 %v106_v8, %v106_v8 }
  0x66   :  { %v96_v15 = vpop.permute.xlu2 %95 }
  0x67   :  { %v107_v17 = vsub.f32 %v96_v15, %v1250_v6 }
  0x69   :  { %v115_v21 = vmul.f32 %v107_v17, %v107_v17 }
  0x74   :  { %v69_v10 = vpop.permute.xlu0 %68  ;;  %v79_v11 = vpop.permute.xlu1 %78 }
  0x75   :  { %v86_v13 = vsub.f32 %v69_v10, %v1256_v9  ;;  %v88_v24 = vsub.f32 %v79_v11, %v1256_v9 }
  0x77   :  { %v110_v14 = vmul.f32 %v86_v13, %v86_v13  ;;  %v112_v28 = vmul.f32 %v88_v24, %v88_v24  ;;  %v35_v13 = vmul.f32 0.5, %v1231_v4 }
  0x79   :  { %v1259_v16 = vadd.f32 %v114_v12, %v110_v14  ;;  %v34_v14 = vmul.f32 0.5, %v1217_v1 }
  0x7b   :  { %391 = vmin.xlane.f32.xlu2 %v1259_v16 }
  0x7c   :  { %v74_v18 = vpop.permute.xlu0 %73  ;;  %v84_v19 = vpop.permute.xlu1 %83 }
  0x7d   :  { %v87_v20 = vsub.f32 %v74_v18, %v1256_v9  ;;  %v89_v25 = vsub.f32 %v84_v19, %v1256_v9 }
  0x7f   :  { %v111_v22 = vmul.f32 %v87_v20, %v87_v20  ;;  %v113_v29 = vmul.f32 %v89_v25, %v89_v25 }
  0x81   :  { %v1264_v23 = vadd.f32 %v115_v21, %v111_v22 }
  0x83   :  { %393 = vmin.xlane.f32.xlu1 %v1264_v23 }
  0x85   :  { %v104_v26 = vpop.permute.xlu1 %103  ;;  %v100_v27 = vpop.permute.xlu0 %99 }
  0x86   :  { %v109_v30 = vsub.f32 %v104_v26, %v1250_v6  ;;  %v108_v31 = vsub.f32 %v100_v27, %v1250_v6 }
  0x88   :  { %v117_v32 = vmul.f32 %v109_v30, %v109_v30  ;;  %v116_v33 = vmul.f32 %v108_v31, %v108_v31 }
  0x8a   :  { %v1271_v34 = vadd.f32 %v117_v32, %v113_v29  ;;  %v1273_v35 = vadd.f32 %v116_v33, %v112_v28 }
  0x8c   :  { %397 = vmin.xlane.f32.xlu2 %v1271_v34  ;;  %395 = vmin.xlane.f32.xlu0 %v1273_v35 }
  0x9c   :  { %42 = vrot.lane.b32.xlu1 %v33_v36, %s1184_s26 }
  0xa0   :  { %40 = vrot.lane.b32.xlu0 %v32_v37, %s1184_s26 }
  0xee   :  { %v392_v40 = vpop.xlane.xlu2 %391 }
  0xef   :  { %vm399_vm0 = vcmp.eq.f32.partialorder %v1259_v16, %v392_v40 }
  0xf0   :  { %v403_v41 = vsel %vm399_vm0, %v1281_v39, 128 }
  0xf1   :  { %v408_v42 = vshra.s32 %v403_v41, 16  ;;  %v407_v56 = vand.u32 65535, %v403_v41 }
  0xf3   :  { %v410_v43 = vcvt.s32.f32 %v408_v42  ;;  %v409_v59 = vcvt.s32.f32 %v407_v56 }
  0xf5   :  { %411 = vmin.xlane.f32.xlu2 %v410_v43 }
  0xf6   :  { %v394_v44 = vpop.xlane.xlu1 %393 }
  0xf7   :  { %vm400_vm1 = vcmp.eq.f32.partialorder %v1264_v23, %v394_v44 }
  0xf8   :  { %v404_v45 = vsel %vm400_vm1, %v1281_v39, 128 }
  0xf9   :  { %v422_v46 = vshra.s32 %v404_v45, 16  ;;  %v421_v61 = vand.u32 65535, %v404_v45 }
  0xfb   :  { %v424_v47 = vcvt.s32.f32 %v422_v46  ;;  %v423_v63 = vcvt.s32.f32 %v421_v61 }
  0xfd   :  { %425 = vmin.xlane.f32.xlu1 %v424_v47 }
  0xff   :  { %v398_v48 = vpop.xlane.xlu2 %397  ;;  %v396_v49 = vpop.xlane.xlu0 %395 }
 0x100   :  { %vm402_vm2 = vcmp.eq.f32.partialorder %v1271_v34, %v398_v48  ;;  %vm401_vm3 = vcmp.eq.f32.partialorder %v1273_v35, %v396_v49 }
 0x101   :  { %v406_v50 = vsel %vm402_vm2, %v1281_v39, 128  ;;  %v405_v51 = vsel %vm401_vm3, %v1281_v39, 128  ;;  %vm2308_vm3 = vcmp.eq.s32.totalorder %v1281_v39, 1 }
 0x102   :  { %v436_v52 = vshra.s32 %v405_v51, 16  ;;  %v450_v53 = vshra.s32 %v406_v50, 16  ;;  %v435_v8 = vand.u32 65535, %v405_v51  ;;  %v449_v32 = vand.u32 65535, %v406_v50 }
 0x104   :  { %v438_v54 = vcvt.s32.f32 %v436_v52  ;;  %v452_v55 = vcvt.s32.f32 %v450_v53  ;;  %v437_v11 = vcvt.s32.f32 %v435_v8  ;;  %v451_v37 = vcvt.s32.f32 %v449_v32 }
 0x106   :  { %439 = vmin.xlane.f32.xlu2 %v438_v54  ;;  %453 = vmin.xlane.f32.xlu0 %v452_v55 }
 0x10e   :  { %v1291_v57 = vpop.permute.xlu1 %42 }
 0x112   :  { %v41_v20 = vpop.permute.xlu0 %40 }
 0x113   :  { %v1324_v30 = vadd.f32 %v41_v20, %v1222_v2 }
 0x168   :  { %v412_v58 = vpop.xlane.xlu2 %411 }
 0x169   :  { %vm413_vm4 = vcmp.eq.f32.partialorder %v410_v43, %v412_v58  ;;  %v418_v43 = vcvt.f32.s32 %v412_v58 }
 0x16a   :  { %v414_v60 = vsel %vm413_vm4, %v409_v59, inf  ;;  %vm2309_vm4 = vcmp.eq.s32.totalorder %v1281_v39, 0 }
 0x16b   :  { %415 = vmin.xlane.f32.xlu1 %v414_v60  ;;  %v419_v45 = vshll.u32 %v418_v43, 16 }
 0x170   :  { %v426_v62 = vpop.xlane.xlu1 %425 }
 0x171   :  { %vm427_vm5 = vcmp.eq.f32.partialorder %v424_v47, %v426_v62  ;;  %v432_v15 = vcvt.f32.s32 %v426_v62 }
 0x172   :  { %v428_v7 = vsel %vm427_vm5, %v423_v63, inf }
 0x173   :  { %429 = vmin.xlane.f32.xlu2 %v428_v7  ;;  %v433_v18 = vshll.u32 %v432_v15, 16 }
 0x179   :  { %v440_v10 = vpop.xlane.xlu2 %439  ;;  %v454_v26 = vpop.xlane.xlu0 %453 }
 0x17a   :  { %vm441_vm6 = vcmp.eq.f32.partialorder %v438_v54, %v440_v10  ;;  %v446_v33 = vcvt.f32.s32 %v440_v10  ;;  %vm455_vm8 = vcmp.eq.f32.partialorder %v452_v55, %v454_v26  ;;  %v460_v53 = vcvt.f32.s32 %v454_v26 }
 0x17b   :  { %v442_v12 = vsel %vm441_vm6, %v437_v11, inf  ;;  %v456_v40 = vsel %vm455_vm8, %v451_v37, inf  ;;  %v53_v26 = vsub.f32 %v1236_v5, %v1291_v57 }
 0x17c   :  { %443 = vmin.xlane.f32.xlu0 %v442_v12  ;;  %v447_v38 = vshll.u32 %v446_v33, 16  ;;  %v461_v55 = vshll.u32 %v460_v53, 16 }
 0x18b   :  { %46 = vrot.lane.b32.xlu2 %v35_v13, %s1184_s26 }
 0x190   :  { %44 = vrot.lane.b32.xlu0 %v34_v14, %s1184_s26 }
 0x1de   :  { %v416_v42 = vpop.xlane.xlu1 %415 }
 0x1df   :  { %v417_v44 = vcvt.f32.s32 %v416_v42 }
 0x1e1   :  { %v1344_v46 = vadd.s32 %v419_v45, %v417_v44 }
 0x1e3   :  { %vm463_vm10 = vcmp.eq.s32.totalorder %v1281_v39, %v1344_v46 }
 0x1e4   :  { %v1352_v47 = vsel %vm463_vm10, inf, %v1259_v16 }
 0x1e6   :  { %v430_v17 = vpop.xlane.xlu2 %429 }
 0x1e7   :  { %v431_v19 = vcvt.f32.s32 %v430_v17 }
 0x1e9   :  { %v1297_v21 = vadd.s32 %v433_v18, %v431_v19 }
 0x1eb   :  { %vm2312_vm7 = vcmp.eq.s32.totalorder %v1281_v39, %v1297_v21 }
 0x1ec   :  { %v1305_v22 = vsel %vm2312_vm7, inf, %v1264_v23  ;;  %v1321_v23 = vsub.f32 %v1222_v2, %v41_v20 }
 0x1ed   :  { %505 = vmin.xlane.f32.xlu0 %v1305_v22 }
 0x1ee   :  { %v1308_v24 = vpop.permute.xlu2 %46  ;;  %v1328_v31 = vsub.f32 %v1324_v30, %v1321_v23 }
 0x1ef   :  { %v1312_v25 = vsub.f32 %v1231_v4, %v1308_v24  ;;  %v444_v27 = vpop.xlane.xlu0 %443 }
 0x1f0   :  { %v445_v36 = vcvt.f32.s32 %v444_v27  ;;  %v1394_v27 = vadd.f32 %v1291_v57, %v1236_v5 }
 0x1f1   :  { %139 = vperm.xlu1 %1155, %v1312_v25  }
 0x1f2   :  { %v1333_v41 = vadd.s32 %v447_v38, %v445_v36  ;;  %v1397_v32 = vsub.f32 %v1394_v27, %v53_v26 }
 0x1f4   :  { %vm465_vm9 = vcmp.eq.s32.totalorder %v1281_v39, %v1333_v41 }
 0x1f5   :  { %v1341_v2 = vsel %vm465_vm9, inf, %v1273_v35 }
 0x1f9   :  { %1158 = vset.pattern.permute.xlu1 %v1183_v3 }
 0x202   :  { %v45_v28 = vpop.permute.xlu0 %44 }
 0x203   :  { %v1317_v29 = vsub.f32 %v1217_v1, %v45_v28  ;;  %v1358_v51 = vadd.f32 %v45_v28, %v1217_v1 }
 0x205   :  { %134 = vperm.xlu2 %1154, %v1317_v29   ;;  %v1362_v52 = vsub.f32 %v1358_v51, %v1317_v29 }
 0x20d   :  { %238 = vrot.lane.b32.xlu2 %v1328_v31, %s1185_s27 }
 0x20e   :  { %1156 = vset.pattern.permute.xlu2 %v1183_v3 }
 0x21b   :  { %457 = vmin.xlane.f32.xlu1 %v456_v40 }
 0x223   :  { %507 = vmin.xlane.f32.xlu1 %v1341_v2 }
 0x236   :  { %503 = vmin.xlane.f32.xlu2 %v1352_v47 }
 0x25f   :  { %v1379_v60 = vpop.permute.xlu2 %134 }
 0x260   :  { %v506_v35 = vpop.xlane.xlu0 %505 }
 0x261   :  { %vm512_vm11 = vcmp.eq.f32.partialorder %v1305_v22, %v506_v35 }
 0x262   :  { %v516_v48 = vsel %vm512_vm11, %v1281_v39, 128 }
 0x263   :  { %v534_v49 = vshra.s32 %v516_v48, 16  ;;  %v1366_v16 = vpop.permute.xlu1 %139  ;;  %v533_v12 = vand.u32 65535, %v516_v48  ;;  %v973_v48 = vsel %vm2309_vm4, %v1297_v21, 0 }
 0x265   :  { %v536_v50 = vcvt.s32.f32 %v534_v49  ;;  %v535_v14 = vcvt.s32.f32 %v533_v12 }
 0x267   :  { %537 = vmin.xlane.f32.xlu1 %v536_v50  ;;  %v1383_v7 = vpop.permute.xlu2 %238 }
 0x280   :  { %242 = vrot.lane.b32.xlu1 %v1362_v52, %s1185_s27 }
 0x28e   :  { %v458_v54 = vpop.xlane.xlu1 %457 }
 0x28f   :  { %v459_v56 = vcvt.f32.s32 %v458_v54 }
 0x291   :  { %v1368_v58 = vadd.s32 %v461_v55, %v459_v56 }
 0x293   :  { %vm466_vm12 = vcmp.eq.s32.totalorder %v1281_v39, %v1368_v58 }
 0x294   :  { %v1376_v1 = vsel %vm466_vm12, inf, %v1271_v34 }
 0x295   :  { %509 = vmin.xlane.f32.xlu2 %v1376_v1 }
 0x296   :  { %v508_v59 = vpop.xlane.xlu1 %507 }
 0x297   :  { %vm513_vm13 = vcmp.eq.f32.partialorder %v1341_v2, %v508_v59 }
 0x298   :  { %v517_v61 = vsel %vm513_vm13, %v1281_v39, 128 }
 0x299   :  { %v548_v62 = vshra.s32 %v517_v61, 16  ;;  %v547_v38 = vand.u32 65535, %v517_v61 }
 0x29b   :  { %v550_v63 = vcvt.s32.f32 %v548_v62  ;;  %v549_v42 = vcvt.s32.f32 %v547_v38 }
 0x29d   :  { %551 = vmin.xlane.f32.xlu2 %v550_v63 }
 0x2a9   :  { %v504_v8 = vpop.xlane.xlu2 %503 }
 0x2aa   :  { %vm511_vm14 = vcmp.eq.f32.partialorder %v1352_v47, %v504_v8 }
 0x2ab   :  { %v515_v34 = vsel %vm511_vm14, %v1281_v39, 128 }
 0x2ac   :  { %v520_v10 = vshra.s32 %v515_v34, 16  ;;  %v519_v28 = vand.u32 65535, %v515_v34 }
 0x2ae   :  { %v522_v11 = vcvt.s32.f32 %v520_v10  ;;  %v521_v36 = vcvt.s32.f32 %v519_v28  ;;  %v972_v10 = vsel %vm2309_vm4, %v1344_v46, 0 }
 0x2b0   :  { %523 = vmin.xlane.f32.xlu0 %v522_v11 }
 0x2da   :  { %v538_v13 = vpop.xlane.xlu1 %537 }
 0x2db   :  { %vm539_vm15 = vcmp.eq.f32.partialorder %v536_v50, %v538_v13  ;;  %v544_v44 = vcvt.f32.s32 %v538_v13  ;;  %v1415_v50 = vadd.f32 %v1308_v24, %v1231_v4 }
 0x2dc   :  { %v540_v15 = vsel %vm539_vm15, %v535_v14, inf }
 0x2dd   :  { %541 = vmin.xlane.f32.xlu2 %v540_v15  ;;  %v545_v57 = vshll.u32 %v544_v44, 16  ;;  %v1419_v53 = vsub.f32 %v1415_v50, %v1312_v25 }
 0x2f2   :  { %v1432_v24 = vpop.permute.xlu1 %242 }
 0x2f5   :  { %147 = vperm.xlu2 %1156, %v1321_v23  }
 0x308   :  { %v510_v17 = vpop.xlane.xlu2 %509 }
 0x309   :  { %vm514_vm0 = vcmp.eq.f32.partialorder %v1376_v1, %v510_v17 }
 0x30a   :  { %v518_v18 = vsel %vm514_vm0, %v1281_v39, 128 }
 0x30b   :  { %v562_v19 = vshra.s32 %v518_v18, 16  ;;  %v561_v54 = vand.u32 65535, %v518_v18 }
 0x30d   :  { %v564_v20 = vcvt.s32.f32 %v562_v19  ;;  %v563_v56 = vcvt.s32.f32 %v561_v54  ;;  %v22_v54 = vld [vmem:[%s2304_s1 + $0x10] sm:$0xff] }
 0x30f   :  { %565 = vmin.xlane.f32.xlu0 %v564_v20 }
 0x310   :  { %v552_v40 = vpop.xlane.xlu2 %551 }
 0x311   :  { %vm553_vm2 = vcmp.eq.f32.partialorder %v550_v63, %v552_v40 }
 0x312   :  { %v554_v43 = vsel %vm553_vm2, %v549_v42, inf }
 0x323   :  { %240 = vrot.lane.b32.xlu0 %v1397_v32, %s1185_s27  ;;  %v524_v33 = vpop.xlane.xlu0 %523 }
 0x324   :  { %vm525_vm1 = vcmp.eq.f32.partialorder %v522_v11, %v524_v33  ;;  %v530_v61 = vcvt.f32.s32 %v524_v33 }
 0x325   :  { %v526_v37 = vsel %vm525_vm1, %v521_v36, inf  ;;  %v975_v36 = vsel %vm2309_vm4, %v1368_v58, 0 }
 0x326   :  { %527 = vmin.xlane.f32.xlu1 %v526_v37  ;;  %v531_v63 = vshll.u32 %v530_v61, 16 }
 0x34d   :  { %555 = vmin.xlane.f32.xlu0 %v554_v43 }
 0x350   :  { %v542_v5 = vpop.xlane.xlu2 %541 }
 0x351   :  { %v543_v45 = vcvt.f32.s32 %v542_v5 }
 0x353   :  { %v1403_v35 = vadd.s32 %v545_v57, %v543_v45 }
 0x355   :  { %v1411_v49 = vsel %vm2308_vm3, %v1403_v35, %v973_v48  ;;  %vm2313_vm6 = vcmp.eq.s32.totalorder %v1281_v39, %v1403_v35 }
 0x356   :  { %v1429_v4 = vsel %vm2313_vm6, inf, %v1305_v22 }
 0x358   :  { %v1515_v43 = vpop.permute.xlu2 %147 }
 0x361   :  { %244 = vrot.lane.b32.xlu0 %v1419_v53, %s1185_s27 }
 0x382   :  { %v566_v55 = vpop.xlane.xlu0 %565 }
 0x383   :  { %vm567_vm5 = vcmp.eq.f32.partialorder %v564_v20, %v566_v55  ;;  %v572_v18 = vcvt.f32.s32 %v566_v55 }
 0x384   :  { %v568_v59 = vsel %vm567_vm5, %v563_v56, inf }
 0x385   :  { %569 = vmin.xlane.f32.xlu1 %v568_v59  ;;  %v60_v59 = vmul.f32 0.5, %v22_v54 }
 0x387   :  { %v1529_v61 = vadd.f32 %v60_v59, %v1256_v9 }
 0x38b   :  { %617 = vmin.xlane.f32.xlu0 %v1429_v4 }
 0x399   :  { %v528_v62 = vpop.xlane.xlu1 %527 }
 0x39a   :  { %v529_v8 = vcvt.f32.s32 %v528_v62 }
 0x39c   :  { %v1434_v34 = vadd.s32 %v531_v63, %v529_v8  ;;  %v1532_v63 = vsub.f32 %v1256_v9, %v60_v59 }
 0x39e   :  { %v1442_v11 = vsel %vm2308_vm3, %v1434_v34, %v972_v10  ;;  %159 = vperm.xlu1 %1158, %v1312_v25   ;;  %vm2311_vm8 = vcmp.eq.s32.totalorder %v1281_v39, %v1434_v34  ;;  %v1459_v25 = vpop.permute.xlu0 %240 }
 0x39f   :  { %151 = vperm.xlu0 %1152, %v53_v26   ;;  %v1451_v22 = vsel %vm2311_vm8, inf, %v1352_v47  ;;  %v558_v47 = vcvt.f32.s32 %v552_v40 }
 0x3a0   :  { %615 = vmin.xlane.f32.xlu2 %v1451_v22 }
 0x3a1   :  { %v559_v13 = vshll.u32 %v558_v47, 16 }
 0x3a6   :  { %1160 = vset.pattern.permute.xlu1 %v2314_v0 }
 0x3a7   :  { %1157 = vset.pattern.permute.xlu0 %v2314_v0  ;;  %173 = vperm.xlu1 %1160, %v1394_v27  }
 0x3a8   :  { %124 = vperm.xlu0 %1157, %v1321_v23   ;;  %v974_v23 = vsel %vm2309_vm4, %v1333_v41, 0 }
 0x3af   :  { %1161 = vset.pattern.permute.xlu1 %v1183_v3 }
 0x3b0   :  { %129 = vperm.xlu0 %1157, %v53_v26   ;;  %v573_v26 = vshll.u32 %v572_v18, 16 }
 0x3b8   :  { %183 = vperm.xlu0 %1157, %v1415_v50   ;;  %155 = vperm.xlu2 %1156, %v1317_v29  }
 0x3c0   :  { %1159 = vset.pattern.permute.xlu2 %v2314_v0  ;;  %v556_v12 = vpop.xlane.xlu0 %555 }
 0x3c1   :  { %v557_v14 = vcvt.f32.s32 %v556_v12  ;;  %168 = vperm.xlu2 %1159, %v1324_v30  }
 0x3c3   :  { %v1465_v15 = vadd.s32 %v559_v13, %v557_v14 }
 0x3c5   :  { %v1473_v17 = vsel %vm2308_vm3, %v1465_v15, %v974_v23  ;;  %vm577_vm11 = vcmp.eq.s32.totalorder %v1281_v39, %v1465_v15 }
 0x3c6   :  { %v1482_v29 = vsel %vm577_vm11, inf, %v1341_v2 }
 0x3c9   :  { %178 = vperm.xlu2 %1159, %v1358_v51  }
 0x3d1   :  { %619 = vmin.xlane.f32.xlu1 %v1482_v29  ;;  %1162 = vset.pattern.permute.xlu2 %v1183_v3 }
 0x3d3   :  { %v1486_v19 = vpop.permute.xlu0 %244 }
 0x3f8   :  { %v570_v20 = vpop.xlane.xlu1 %569 }
 0x3f9   :  { %v571_v28 = vcvt.f32.s32 %v570_v20 }
 0x3fb   :  { %v1488_v33 = vadd.s32 %v573_v26, %v571_v28 }
 0x3fd   :  { %2331 = vst [vmem:[#allocation2_spill] sm:$0xff] %v1488_v33  ;;  %v1496_v2 = vsel %vm2308_vm3, %v1488_v33, %v975_v36  ;;  %vm2310_vm13 = vcmp.eq.s32.totalorder %v1281_v39, %v1488_v33 }
 0x3fe   :  { %v618_v3 = vpop.xlane.xlu0 %617  ;;  %v1504_v37 = vsel %vm2310_vm13, inf, %v1376_v1 }
 0x3ff   :  { %vm624_vm14 = vcmp.eq.f32.partialorder %v1429_v4, %v618_v3  ;;  %621 = vmin.xlane.f32.xlu2 %v1504_v37 }
 0x400   :  { %v1509_v38 = vsel %vm624_vm14, %v1281_v39, 128 }
 0x401   :  { %v646_v40 = vshra.s32 %v1509_v38, 16 }
 0x403   :  { %v1512_v42 = vcvt.s32.f32 %v646_v40 }
 0x407   :  { %649 = vmin.xlane.f32.xlu2 %v1512_v42 }
 0x410   :  { %v1521_v57 = vpop.permute.xlu1 %159 }
 0x411   :  { %v1517_v44 = vpop.permute.xlu0 %151 }
 0x412   :  { %vm358_vm3 = vcmp.le.f32.partialorder %v1517_v44, %v1250_v6 }
 0x413   :  { %v616_v5 = vpop.xlane.xlu2 %615 }
 0x414   :  { %vm623_vm15 = vcmp.eq.f32.partialorder %v1451_v22, %v616_v5 }
 0x415   :  { %v627_v1 = vsel %vm623_vm15, %v1281_v39, 128 }
 0x416   :  { %v632_v45 = vshra.s32 %v627_v1, 16 }
 0x418   :  { %v634_v48 = vcvt.s32.f32 %v632_v45 }
 0x419   :  { %v174_v62 = vpop.permute.xlu1 %173 }
 0x41a   :  { %635 = vmin.xlane.f32.xlu1 %v634_v48  ;;  %v125_v55 = vpop.permute.xlu0 %124  ;;  %v187_v10 = vmin.f32 %v174_v62, %v1529_v61  ;;  %vm350_vm0 = vcmp.le.f32.partialorder %v1256_v9, %v174_v62 }
 0x41b   :  { %v1526_v56 = vpop.permute.xlu2 %155  ;;  %v142_v13 = vmax.f32 %v125_v55, %v1532_v63  ;;  %vm345_vm2 = vcmp.le.f32.partialorder %v125_v55, %v1256_v9 }
 0x41c   :  { %vm359_vm8 = vcmp.le.f32.partialorder %v1526_v56, %v1250_v6 }
 0x422   :  { %v130_v8 = vpop.permute.xlu0 %129 }
 0x423   :  { %v143_v47 = vmax.f32 %v130_v8, %v1532_v63  ;;  %vm346_vm1 = vcmp.le.f32.partialorder %v130_v8, %v1256_v9  ;;  %v169_v12 = vpop.permute.xlu2 %168  ;;  %v645_v8 = vand.u32 65535, %v1509_v38 }
 0x424   :  { %vm354_vm5 = vmand %vm346_vm1, %vm350_vm0  ;;  %v186_v14 = vmin.f32 %v169_v12, %v1529_v61  ;;  %vm349_vm14 = vcmp.le.f32.partialorder %v1256_v9, %v169_v12  ;;  %vm348_vm0 = vcmp.le.f32.partialorder %v1366_v16, %v1256_v9 }
 0x425   :  { %v1542_v23 = vsub.f32 %v187_v10, %v143_v47  ;;  %vm1544_vm15 = vmand %vm345_vm2, %vm349_vm14  ;;  %vm347_vm2 = vcmp.le.f32.partialorder %v1379_v60, %v1256_v9  ;;  %v647_v12 = vcvt.s32.f32 %v645_v8 }
 0x426   :  { %v210_v20 = vsub.f32 %v186_v14, %v142_v13  ;;  %vm1550_vm4 = vmand %vm354_vm5, %vm358_vm3  ;;  %vm360_vm5 = vcmp.le.f32.partialorder %v1521_v57, %v1250_v6  ;;  %v631_v14 = vand.u32 65535, %v627_v1 }
 0x42a   :  { %v1554_v28 = vpop.permute.xlu0 %183 }
 0x42b   :  { %vm352_vm1 = vcmp.le.f32.partialorder %v1256_v9, %v1554_v28  ;;  %v1560_v36 = vpop.permute.xlu2 %178 }
 0x42c   :  { %vm356_vm14 = vmand %vm348_vm0, %vm352_vm1  ;;  %vm351_vm3 = vcmp.le.f32.partialorder %v1256_v9, %v1560_v36 }
 0x42d   :  { %vm355_vm13 = vmand %vm347_vm2, %vm351_vm3 }
 0x42e   :  { %vm1570_vm7 = vmand %vm356_vm14, %vm360_vm5  ;;  %vm357_vm14 = vcmp.le.f32.partialorder %v1515_v43, %v1250_v6 }
 0x42f   :  { %vm1574_vm6 = vmand %vm355_vm13, %vm359_vm8 }
 0x430   :  { %vm361_vm3 = vmand %vm1544_vm15, %vm357_vm14  ;;  %vm2317_vm15 = vcmp.eq.s32.totalorder %v1281_v39, 2 }
 0x444   :  { %v620_v5 = vpop.xlane.xlu1 %619 }
 0x445   :  { %vm625_vm0 = vcmp.eq.f32.partialorder %v1482_v29, %v620_v5 }
 0x446   :  { %v629_v9 = vsel %vm625_vm0, %v1281_v39, 128 }
 0x447   :  { %v660_v45 = vshra.s32 %v629_v9, 16 }
 0x449   :  { %v662_v54 = vcvt.s32.f32 %v660_v45  ;;  %v633_v45 = vcvt.s32.f32 %v631_v14 }
 0x44b   :  { %663 = vmin.xlane.f32.xlu1 %v662_v54 }
 0x464   :  { %191 = vperm.xlu1 %1161, %v1324_v30  }
 0x472   :  { %v622_v55 = vpop.xlane.xlu2 %621 }
 0x473   :  { %vm626_vm1 = vcmp.eq.f32.partialorder %v1504_v37, %v622_v55  ;;  %v659_v55 = vand.u32 65535, %v629_v9 }
 0x474   :  { %v630_v59 = vsel %vm626_vm1, %v1281_v39, 128 }
 0x475   :  { %v674_v62 = vshra.s32 %v630_v59, 16  ;;  %v661_v33 = vcvt.s32.f32 %v659_v55 }
 0x477   :  { %v676_v10 = vcvt.s32.f32 %v674_v62 }
 0x479   :  { %677 = vmin.xlane.f32.xlu2 %v676_v10 }
 0x47a   :  { %v650_v47 = vpop.xlane.xlu2 %649 }
 0x47b   :  { %vm651_vm8 = vcmp.eq.f32.partialorder %v1512_v42, %v650_v47  ;;  %v23_v42 = vld [vmem:[%s2304_s1 + $0x18] sm:$0xff] }
 0x47c   :  { %v652_v13 = vsel %vm651_vm8, %v647_v12, inf  ;;  %v62_v62 = vmul.f32 0.5, %v23_v42  ;;  %v214_v12 = vmax.f32 %v210_v20, 0.0 }
 0x47d   :  { %653 = vmin.xlane.f32.xlu0 %v652_v13 }
 0x47e   :  { %v1590_v1 = vsub.f32 %v1250_v6, %v62_v62 }
 0x480   :  { %v162_v9 = vmax.f32 %v1515_v43, %v1590_v1  ;;  %v656_v43 = vcvt.f32.s32 %v650_v47  ;;  %v163_v20 = vmax.f32 %v1517_v44, %v1590_v1 }
 0x482   :  { %v657_v42 = vshll.u32 %v656_v43, 16 }
 0x48d   :  { %v636_v5 = vpop.xlane.xlu1 %635 }
 0x48e   :  { %vm637_vm13 = vcmp.eq.f32.partialorder %v634_v48, %v636_v5  ;;  %v1593_v48 = vadd.f32 %v62_v62, %v1250_v6 }
 0x48f   :  { %v638_v30 = vsel %vm637_vm13, %v633_v45, inf  ;;  %v673_v45 = vand.u32 65535, %v630_v59 }
 0x490   :  { %639 = vmin.xlane.f32.xlu1 %v638_v30 }
 0x491   :  { %195 = vperm.xlu2 %1162, %v1394_v27   ;;  %v675_v55 = vcvt.s32.f32 %v673_v45 }
 0x4be   :  { %v664_v0 = vpop.xlane.xlu1 %663 }
 0x4bf   :  { %vm665_vm2 = vcmp.eq.f32.partialorder %v662_v54, %v664_v0 }
 0x4c0   :  { %v666_v38 = vsel %vm665_vm2, %v661_v33, inf }
 0x4c1   :  { %667 = vmin.xlane.f32.xlu2 %v666_v38 }
 0x4d6   :  { %v192_v27 = vpop.permute.xlu1 %191 }
 0x4d7   :  { %v206_v33 = vmin.f32 %v192_v27, %v1593_v48  ;;  %vm365_vm5 = vcmp.le.f32.partialorder %v1250_v6, %v192_v27 }
 0x4d8   :  { %vm1603_vm0 = vmand %vm361_vm3, %vm365_vm5 }
 0x4d9   :  { %v218_v8 = vsub.f32 %v206_v33, %v162_v9  ;;  %v215_v33 = vmax.f32 %v1542_v23, 0.0  ;;  %v2344_v23 = vmov 0  }
 0x4db   :  { %v222_v13 = vmax.f32 %v218_v8, 0.0 }
 0x4dd   :  { %v1607_v14 = vmul.f32 %v222_v13, %v214_v12  ;;  %v642_v12 = vcvt.f32.s32 %v636_v5  ;;  %v670_v5 = vcvt.f32.s32 %v664_v0 }
 0x4df   :  { %v643_v45 = vshll.u32 %v642_v12, 16 }
 0x4ec   :  { %v678_v30 = vpop.xlane.xlu2 %677 }
 0x4ed   :  { %vm679_vm1 = vcmp.eq.f32.partialorder %v676_v10, %v678_v30  ;;  %v684_v0 = vcvt.f32.s32 %v678_v30  ;;  %v189_v30 = vmin.f32 %v1554_v28, %v1529_v61  ;;  %v250_v28 = vmul.f32 %v1383_v7, %v1328_v31 }
 0x4ee   :  { %v680_v38 = vsel %vm679_vm1, %v675_v55, inf }
 0x4ef   :  { %681 = vmin.xlane.f32.xlu1 %v680_v38 }
 0x4f0   :  { %v654_v18 = vpop.xlane.xlu0 %653 }
 0x4f1   :  { %v655_v62 = vcvt.f32.s32 %v654_v18  ;;  %v671_v18 = vshll.u32 %v670_v5, 16 }
 0x4f3   :  { %v1610_v27 = vadd.s32 %v657_v42, %v655_v62 }
 0x4f4   :  { %v196_v9 = vpop.permute.xlu2 %195 }
 0x4f5   :  { %v1618_v59 = vsel %vm2317_vm15, %v1610_v27, %v1411_v49  ;;  %v207_v10 = vmin.f32 %v196_v9, %v1593_v48  ;;  %vm366_vm8 = vcmp.le.f32.partialorder %v1250_v6, %v196_v9  ;;  %vm688_vm13 = vcmp.eq.s32.totalorder %v1281_v39, %v1610_v27 }
 0x4f6   :  { %vm1626_vm2 = vmand %vm1550_vm4, %vm366_vm8  ;;  %v724_v44 = vsel %vm688_vm13, inf, %v1429_v4 }
 0x4f7   :  { %v219_v49 = vsub.f32 %v207_v10, %v163_v20  ;;  %729 = vmin.xlane.f32.xlu2 %v724_v44  ;;  %v685_v20 = vshll.u32 %v684_v0, 16 }
 0x4f9   :  { %v223_v8 = vmax.f32 %v219_v49, 0.0  ;;  %v145_v49 = vmax.f32 %v1366_v16, %v1532_v63 }
 0x4fb   :  { %v1635_v6 = vmul.f32 %v223_v8, %v215_v33  ;;  %v213_v8 = vsub.f32 %v189_v30, %v145_v49 }
 0x503   :  { %v640_v13 = vpop.xlane.xlu1 %639 }
 0x504   :  { %v641_v26 = vcvt.f32.s32 %v640_v13 }
 0x506   :  { %v1637_v55 = vadd.s32 %v643_v45, %v641_v26  ;;  %v217_v45 = vmax.f32 %v213_v8, 0.0 }
 0x508   :  { %v1643_v43 = vsel %vm2317_vm15, %v1637_v55, %v1442_v11  ;;  %vm687_vm4 = vcmp.eq.s32.totalorder %v1281_v39, %v1637_v55 }
 0x509   :  { %v723_v4 = vsel %vm687_vm4, inf, %v1451_v22 }
 0x50a   :  { %727 = vmin.xlane.f32.xlu0 %v723_v4 }
 0x50f   :  { %203 = vperm.xlu2 %1162, %v1415_v50  }
 0x517   :  { %1164 = vset.pattern.permute.xlu2 %v2344_v23 }
 0x534   :  { %v668_v38 = vpop.xlane.xlu2 %667 }
 0x535   :  { %v669_v42 = vcvt.f32.s32 %v668_v38 }
 0x537   :  { %v1653_v62 = vadd.s32 %v671_v18, %v669_v42 }
 0x539   :  { %v1659_v11 = vsel %vm2317_vm15, %v1653_v62, %v1473_v17  ;;  %vm2318_vm14 = vcmp.eq.s32.totalorder %v1281_v39, %v1653_v62 }
 0x53a   :  { %v725_v50 = vsel %vm2318_vm14, inf, %v1482_v29 }
 0x53b   :  { %731 = vmin.xlane.f32.xlu1 %v725_v50 }
 0x554   :  { %199 = vperm.xlu1 %1161, %v1358_v51  }
 0x55c   :  { %1163 = vset.pattern.permute.xlu1 %v2344_v23 }
 0x562   :  { %v682_v22 = vpop.xlane.xlu1 %681 }
 0x563   :  { %v683_v9 = vcvt.f32.s32 %v682_v22 }
 0x565   :  { %v1669_v10 = vadd.s32 %v685_v20, %v683_v9  ;;  %v253_v20 = vmul.f32 %v1486_v19, %v1419_v53  ;;  %v144_v9 = vmax.f32 %v1379_v60, %v1532_v63  ;;  %v252_v53 = vmul.f32 %v1432_v24, %v1362_v52 }
 0x566   :  { %v255_v52 = vsub.f32 %v1593_v48, %v1590_v1 }
 0x567   :  { %v1675_v17 = vsel %vm2317_vm15, %v1669_v10, %v1496_v2  ;;  %vm2319_vm3 = vcmp.eq.s32.totalorder %v1281_v39, %v1669_v10  ;;  %v165_v2 = vmax.f32 %v1521_v57, %v1590_v1 }
 0x568   :  { %v726_v51 = vsel %vm2319_vm3, inf, %v1504_v37 }
 0x569   :  { %733 = vmin.xlane.f32.xlu0 %v726_v51 }
 0x56a   :  { %v730_v29 = vpop.xlane.xlu2 %729 }
 0x56b   :  { %vm736_vm1 = vcmp.eq.f32.partialorder %v724_v44, %v730_v29  ;;  %v188_v44 = vmin.f32 %v1560_v36, %v1529_v61  ;;  %v164_v29 = vmax.f32 %v1526_v56, %v1590_v1 }
 0x56c   :  { %v740_v18 = vsel %vm736_vm1, %v1281_v39, 128 }
 0x56d   :  { %v758_v42 = vshra.s32 %v740_v18, 16  ;;  %v212_v30 = vsub.f32 %v188_v44, %v144_v9 }
 0x56f   :  { %v760_v0 = vcvt.s32.f32 %v758_v42  ;;  %v216_v19 = vmax.f32 %v212_v30, 0.0 }
 0x572   :  { %v1687_v33 = vpop.permute.xlu2 %203 }
 0x573   :  { %v209_v12 = vmin.f32 %v1687_v33, %v1593_v48 }
 0x575   :  { %v221_v13 = vsub.f32 %v209_v12, %v165_v2 }
 0x577   :  { %v225_v37 = vmax.f32 %v221_v13, 0.0 }
 0x579   :  { %v1693_v26 = vmul.f32 %v225_v37, %v217_v45  ;;  %v254_v45 = vsub.f32 %v1529_v61, %v1532_v63 }
 0x57b   :  { %v1739_v24 = vmul.f32 %v255_v52, %v254_v45 }
 0x57d   :  { %259 = vperm.xlu0 %1157, %v250_v28   ;;  %v728_v5 = vpop.xlane.xlu0 %727 }
 0x57e   :  { %vm735_vm5 = vcmp.eq.f32.partialorder %v723_v4, %v728_v5 }
 0x57f   :  { %v1698_v16 = vsel %vm735_vm5, %v1281_v39, 128 }
 0x580   :  { %v744_v57 = vshra.s32 %v1698_v16, 16  ;;  %v743_v54 = vand.u32 65535, %v1698_v16 }
 0x582   :  { %v1701_v38 = vcvt.s32.f32 %v744_v57  ;;  %v251_v57 = vmul.f32 %v1459_v25, %v1397_v32 }
 0x584   :  { %747 = vmin.xlane.f32.xlu1 %v1701_v38 }
 0x5a7   :  { %761 = vmin.xlane.f32.xlu0 %v760_v0 }
 0x5ae   :  { %v732_v22 = vpop.xlane.xlu1 %731 }
 0x5af   :  { %vm737_vm8 = vcmp.eq.f32.partialorder %v725_v50, %v732_v22 }
 0x5b0   :  { %v1706_v31 = vsel %vm737_vm8, %v1281_v39, 128 }
 0x5b1   :  { %v772_v7 = vshra.s32 %v1706_v31, 16 }
 0x5b3   :  { %v1709_v4 = vcvt.s32.f32 %v772_v7 }
 0x5b5   :  { %775 = vmin.xlane.f32.xlu2 %v1709_v4 }
 0x5bb   :  { %274 = vperm.xlu0 %1157, %v253_v20  }
 0x5c6   :  { %v1718_v50 = vpop.permute.xlu1 %199 }
 0x5c7   :  { %v208_v49 = vmin.f32 %v1718_v50, %v1593_v48  ;;  %v1186_v48 = vmov 0.0  }
 0x5c8   :  { %v1124_v20 = vsel %vm1603_vm0, 1.0, %v1186_v48 }
 0x5c9   :  { %v220_v2 = vsub.f32 %v208_v49, %v164_v29  ;;  %v381_v32 = vmul.f32 2.0, %v1124_v20  ;;  %v757_v49 = vand.u32 65535, %v740_v18 }
 0x5cb   :  { %v224_v8 = vmax.f32 %v220_v2, 0.0 }
 0x5cd   :  { %269 = vperm.xlu2 %1164, %v252_v53   ;;  %v1726_v36 = vmul.f32 %v224_v8, %v216_v19  ;;  %v759_v53 = vcvt.s32.f32 %v757_v49 }
 0x5dc   :  { %v734_v12 = vpop.xlane.xlu0 %733 }
 0x5dd   :  { %vm738_vm5 = vcmp.eq.f32.partialorder %v726_v51, %v734_v12  ;;  %v745_v12 = vcvt.s32.f32 %v743_v54 }
 0x5de   :  { %v1729_v60 = vsel %vm738_vm5, %v1281_v39, 128 }
 0x5df   :  { %v786_v56 = vshra.s32 %v1729_v60, 16 }
 0x5e1   :  { %v1732_v13 = vcvt.s32.f32 %v786_v56 }
 0x5e3   :  { %789 = vmin.xlane.f32.xlu1 %v1732_v13 }
 0x5ef   :  { %v260_v37 = vpop.permute.xlu0 %259 }
 0x5f0   :  { %v277_v51 = vadd.f32 %v260_v37, %v1739_v24 }
 0x5f2   :  { %v281_v28 = vsub.f32 %v277_v51, %v1607_v14 }
 0x5f4   :  { %1165 = vrcp.f32 %v281_v28  ;;  %v296_v7 = vand.u32 2147483648, %v281_v28  ;;  %v294_v63 = vand.u32 2147483647, %v281_v28  ;;  %vm290_vm8 = vweird.f32 %v281_v28 }
 0x5f6   :  { %v297_v44 = vor.u32 1.1754944e-38, %v296_v7  ;;  %vm295_vm15 = vcmp.eq.f32.partialorder %v294_v63, 8.507059e+37 }
 0x5f7   :  { %v1755_v8 = vpop.xlane.xlu1 %747 }
 0x5f8   :  { %vm749_vm0 = vcmp.eq.f32.partialorder %v1701_v38, %v1755_v8  ;;  %v754_v55 = vcvt.f32.s32 %v1755_v8 }
 0x5f9   :  { %v750_v56 = vsel %vm749_vm0, %v745_v12, inf }
 0x5fa   :  { %v1166_v5 = vpop.eup %1165  ;;  %v755_v8 = vshll.u32 %v754_v55, 16 }
 0x5fb   :  { %v286_v42 = vmul.f32 %v1166_v5, %v281_v28  ;;  %vm291_vm1 = vweird.f32 %v1166_v5 }
 0x5fc   :  { %264 = vperm.xlu1 %1163, %v251_v57   ;;  %vm292_vm5 = vmor %vm290_vm8, %vm291_vm1 }
 0x5fd   :  { %v287_v22 = vsub.f32 1.0, %v286_v42 }
 0x5ff   :  { %v288_v61 = vmul.f32 %v1166_v5, %v287_v22 }
 0x601   :  { %v289_v1 = vadd.f32 %v1166_v5, %v288_v61 }
 0x603   :  { %v293_v9 = vsel %vm292_vm5, %v1166_v5, %v289_v1  ;;  %v1181_v5 = vld [vmem:[%s2304_s1 + $0x8] sm:$0xff] }
 0x604   :  { %v298_v29 = vsel %vm295_vm15, %v297_v44, %v293_v9  ;;  %vm367_vm1 = vcmp.le.f32.partialorder %v1181_v5, %v1718_v50 }
 0x605   :  { %v341_v25 = vmul.f32 %v298_v29, %v1607_v14  ;;  %v771_v14 = vand.u32 65535, %v1706_v31  ;;  %vm371_vm5 = vmand %vm1574_vm6, %vm367_vm1 }
 0x607   :  { %v1749_v30 = vadd.f32 %v381_v32, %v341_v25  ;;  %v773_v45 = vcvt.s32.f32 %v771_v14 }
 0x609   :  { %v467_v16 = vsel %vm463_vm10, %v1749_v30, 0.0 }
 0x61a   :  { %v1751_v2 = vpop.xlane.xlu0 %761 }
 0x61b   :  { %vm763_vm14 = vcmp.eq.f32.partialorder %v760_v0, %v1751_v2 }
 0x61c   :  { %v764_v19 = vsel %vm763_vm14, %v759_v53, inf  ;;  %vm368_vm14 = vcmp.le.f32.partialorder %v1181_v5, %v1687_v33  ;;  %v1126_v53 = vsel %vm371_vm5, 1.0, %v1186_v48  ;;  %vm2346_vm5 = vcmp.eq.s32.totalorder %v1281_v39, %v1297_v21 }
 0x61d   :  { %765 = vmin.xlane.f32.xlu2 %v764_v19  ;;  %vm372_vm10 = vmand %vm1570_vm7, %vm368_vm14 }
 0x61e   :  { %v1127_v20 = vsel %vm372_vm10, 1.0, %v1186_v48 }
 0x61f   :  { %v384_v49 = vmul.f32 2.0, %v1127_v20 }
 0x626   :  { %751 = vmin.xlane.f32.xlu1 %v750_v56  ;;  %v383_v56 = vmul.f32 2.0, %v1126_v53 }
 0x628   :  { %v1760_v18 = vpop.xlane.xlu2 %775 }
 0x629   :  { %vm777_vm15 = vcmp.eq.f32.partialorder %v1709_v4, %v1760_v18 }
 0x62a   :  { %v778_v0 = vsel %vm777_vm15, %v773_v45, inf }
 0x62b   :  { %779 = vmin.xlane.f32.xlu0 %v778_v0 }
 0x62d   :  { %v275_v52 = vpop.permute.xlu0 %274 }
 0x62e   :  { %v280_v38 = vadd.f32 %v275_v52, %v1739_v24  ;;  %471 = vadd.xlane.f32.xlu1 %v467_v16 }
 0x630   :  { %v284_v31 = vsub.f32 %v280_v38, %v1693_v26  ;;  %v270_v37 = vpop.permute.xlu2 %269 }
 0x631   :  { %v279_v51 = vadd.f32 %v270_v37, %v1739_v24 }
 0x632   :  { %1167 = vrcp.f32 %v284_v31  ;;  %v338_v22 = vand.u32 2147483648, %v284_v31  ;;  %v336_v63 = vand.u32 2147483647, %v284_v31  ;;  %vm332_vm0 = vweird.f32 %v284_v31 }
 0x633   :  { %v283_v28 = vsub.f32 %v279_v51, %v1726_v36 }
 0x634   :  { %v339_v9 = vor.u32 1.1754944e-38, %v338_v22  ;;  %vm337_vm14 = vcmp.eq.f32.partialorder %v336_v63, 8.507059e+37 }
 0x635   :  { %1169 = vrcp.f32 %v283_v28  ;;  %v324_v44 = vand.u32 2147483648, %v283_v28  ;;  %v322_v29 = vand.u32 2147483647, %v283_v28  ;;  %vm318_vm3 = vweird.f32 %v283_v28 }
 0x637   :  { %v325_v40 = vor.u32 1.1754944e-38, %v324_v44  ;;  %vm323_vm6 = vcmp.eq.f32.partialorder %v322_v29, 8.507059e+37  ;;  %v2349_v29 = vld [vmem:[#allocation2_spill] sm:$0xff] }
 0x638   :  { %v1168_v4 = vpop.eup %1167 }
 0x639   :  { %v328_v46 = vmul.f32 %v1168_v4, %v284_v31  ;;  %vm333_vm8 = vweird.f32 %v1168_v4 }
 0x63a   :  { %vm334_vm15 = vmor %vm332_vm0, %vm333_vm8  ;;  %vm2345_vm8 = vcmp.eq.s32.totalorder %v1281_v39, %v1403_v35  ;;  %v691_v35 = vsel %vm687_vm4, %v1749_v30, 0.0  ;;  %vm2320_vm0 = vcmask 31744   ;;  %vm2348_vm4 = vcmp.eq.s32.totalorder %v1281_v39, %v1669_v10 }
 0x63b   :  { %v1170_v57 = vpop.eup %1169  ;;  %v329_v42 = vsub.f32 1.0, %v328_v46 }
 0x63c   :  { %v314_v7 = vmul.f32 %v1170_v57, %v283_v28  ;;  %vm319_vm7 = vweird.f32 %v1170_v57 }
 0x63d   :  { %v330_v61 = vmul.f32 %v1168_v4, %v329_v42  ;;  %vm320_vm10 = vmor %vm318_vm3, %vm319_vm7  ;;  %vm2350_vm7 = vcmp.eq.s32.totalorder %v1281_v39, %v2349_v29 }
 0x63e   :  { %v315_v1 = vsub.f32 1.0, %v314_v7 }
 0x63f   :  { %v331_v33 = vadd.f32 %v1168_v4, %v330_v61 }
 0x640   :  { %v316_v3 = vmul.f32 %v1170_v57, %v315_v1 }
 0x641   :  { %v335_v50 = vsel %vm334_vm15, %v1168_v4, %v331_v33  ;;  %v768_v33 = vcvt.f32.s32 %v1751_v2 }
 0x642   :  { %v340_v32 = vsel %vm337_vm14, %v339_v9, %v335_v50  ;;  %v317_v25 = vadd.f32 %v1170_v57, %v316_v3 }
 0x643   :  { %v344_v19 = vmul.f32 %v340_v32, %v1693_v26 }
 0x644   :  { %v321_v54 = vsel %vm320_vm10, %v1170_v57, %v317_v25  ;;  %v782_v25 = vcvt.f32.s32 %v1760_v18  ;;  %vm2351_vm10 = vcmp.eq.s32.totalorder %v1281_v39, %v1653_v62 }
 0x645   :  { %v326_v12 = vsel %vm323_vm6, %v325_v40, %v321_v54  ;;  %v1784_v14 = vadd.f32 %v384_v49, %v344_v19 }
 0x646   :  { %v343_v45 = vmul.f32 %v326_v12, %v1726_v36  ;;  %v785_v36 = vand.u32 65535, %v1729_v60  ;;  %v783_v10 = vshll.u32 %v782_v25, 16 }
 0x647   :  { %v470_v0 = vsel %vm466_vm12, %v1784_v14, 0.0  ;;  %v694_v3 = vsel %vm2348_vm4, %v1784_v14, 0.0 }
 0x648   :  { %477 = vadd.xlane.f32.xlu1 %v470_v0  ;;  %v1791_v52 = vadd.f32 %v383_v56, %v343_v45  ;;  %v787_v58 = vcvt.s32.f32 %v785_v36 }
 0x64a   :  { %v469_v26 = vsel %vm465_vm9, %v1791_v52, 0.0  ;;  %v581_v16 = vsel %vm577_vm11, %v1791_v52, 0.0  ;;  %v693_v18 = vsel %vm2351_vm10, %v1791_v52, 0.0 }
 0x64b   :  { %475 = vadd.xlane.f32.xlu0 %v469_v26 }
 0x650   :  { %587 = vadd.xlane.f32.xlu1 %v581_v16 }
 0x656   :  { %v1802_v38 = vpop.xlane.xlu1 %789 }
 0x657   :  { %vm791_vm12 = vcmp.eq.f32.partialorder %v1732_v13, %v1802_v38  ;;  %v1125_v13 = vsel %vm1626_vm2, 1.0, %v1186_v48  ;;  %vm2347_vm2 = vcmp.eq.s32.totalorder %v1281_v39, %v1434_v34  ;;  %v796_v62 = vcvt.f32.s32 %v1802_v38 }
 0x658   :  { %v792_v31 = vsel %vm791_vm12, %v787_v58, inf  ;;  %v382_v7 = vmul.f32 2.0, %v1125_v13  ;;  %v579_v21 = vsel %vm2347_vm2, %v1749_v30, 0.0 }
 0x659   :  { %793 = vmin.xlane.f32.xlu2 %v792_v31  ;;  %v797_v45 = vshll.u32 %v796_v62, 16 }
 0x66e   :  { %v265_v37 = vpop.permute.xlu1 %264 }
 0x66f   :  { %v278_v41 = vadd.f32 %v265_v37, %v1739_v24 }
 0x671   :  { %v282_v51 = vsub.f32 %v278_v41, %v1635_v6 }
 0x673   :  { %1171 = vrcp.f32 %v282_v51  ;;  %v310_v5 = vand.u32 2147483648, %v282_v51  ;;  %v308_v60 = vand.u32 2147483647, %v282_v51  ;;  %vm304_vm11 = vweird.f32 %v282_v51 }
 0x675   :  { %v311_v42 = vor.u32 1.1754944e-38, %v310_v5  ;;  %vm309_vm1 = vcmp.eq.f32.partialorder %v308_v60, 8.507059e+37 }
 0x679   :  { %v1172_v28 = vpop.eup %1171 }
 0x67a   :  { %v300_v15 = vmul.f32 %v1172_v28, %v282_v51  ;;  %vm305_vm9 = vweird.f32 %v1172_v28 }
 0x67b   :  { %vm306_vm3 = vmor %vm304_vm11, %vm305_vm9 }
 0x67c   :  { %v301_v4 = vsub.f32 1.0, %v300_v15 }
 0x67e   :  { %v302_v46 = vmul.f32 %v1172_v28, %v301_v4 }
 0x680   :  { %v303_v57 = vadd.f32 %v1172_v28, %v302_v46 }
 0x682   :  { %v307_v22 = vsel %vm306_vm3, %v1172_v28, %v303_v57 }
 0x683   :  { %v312_v24 = vsel %vm309_vm1, %v311_v42, %v307_v22 }
 0x684   :  { %v342_v61 = vmul.f32 %v312_v24, %v1635_v6  ;;  %v769_v6 = vshll.u32 %v768_v33, 16 }
 0x686   :  { %v386_v63 = vadd.f32 %v382_v7, %v342_v61 }
 0x688   :  { %v580_v1 = vsel %vm2345_vm8, %v386_v63, 0.0  ;;  %v468_v20 = vsel %vm2346_vm5, %v386_v63, 0.0  ;;  %v692_v47 = vsel %vm688_vm13, %v386_v63, 0.0  ;;  %vm2321_vm13 = vcmp.eq.s32.totalorder %v1281_v39, 3 }
 0x689   :  { %585 = vadd.xlane.f32.xlu0 %v580_v1  ;;  %473 = vadd.xlane.f32.xlu2 %v468_v20 }
 0x68a   :  { %697 = vadd.xlane.f32.xlu1 %v692_v47 }
 0x690   :  { %v766_v44 = vpop.xlane.xlu2 %765 }
 0x691   :  { %v767_v9 = vcvt.f32.s32 %v766_v44  ;;  %695 = vadd.xlane.f32.xlu0 %v691_v35  ;;  %583 = vadd.xlane.f32.xlu2 %v579_v21 }
 0x693   :  { %v770_v27 = vadd.s32 %v769_v6, %v767_v9 }
 0x695   :  { %v1084_v2 = vsel %vm2321_vm13, %v770_v27, %v1618_v59  ;;  %vm800_vm15 = vcmp.eq.s32.totalorder %v1281_v39, %v770_v27  ;;  %v582_v59 = vsel %vm2350_vm7, %v1784_v14, 0.0 }
 0x696   :  { %1109 = vst.msk [vmem:[%s2305_s3 + $0x8] sm:$0xff] %vm2320_vm0, %v1084_v2  ;;  %v804_v34 = vsel %vm800_vm15, %v386_v63, 0.0 }
 0x699   :  { %v752_v50 = vpop.xlane.xlu1 %751  ;;  %701 = vadd.xlane.f32.xlu0 %v694_v3  ;;  %589 = vadd.xlane.f32.xlu2 %v582_v59 }
 0x69a   :  { %v753_v32 = vcvt.f32.s32 %v752_v50 }
 0x69c   :  { %v756_v49 = vadd.s32 %v755_v8, %v753_v32 }
 0x69e   :  { %v1083_v53 = vsel %vm2321_vm13, %v756_v49, %v1643_v43  ;;  %v780_v19 = vpop.xlane.xlu0 %779  ;;  %vm799_vm14 = vcmp.eq.s32.totalorder %v1281_v39, %v756_v49 }
 0x69f   :  { %1108 = vst.msk [vmem:[%s2305_s3] sm:$0xff] %vm2320_vm0, %v1083_v53  ;;  %v781_v40 = vcvt.f32.s32 %v780_v19  ;;  %v803_v54 = vsel %vm799_vm14, %v1749_v30, 0.0 }
 0x6a0   :  { %807 = vadd.xlane.f32.xlu1 %v803_v54 }
 0x6a1   :  { %v784_v12 = vadd.s32 %v783_v10, %v781_v40  ;;  %699 = vadd.xlane.f32.xlu2 %v693_v18  ;;  %v1881_v16 = vpop.xlane.xlu1 %471 }
 0x6a2   :  { %vm479_vm11 = vcmp.gt.f32.partialorder %v1881_v16, 1.5 }
 0x6a3   :  { %v1085_v43 = vsel %vm2321_vm13, %v784_v12, %v1659_v11  ;;  %vm801_vm6 = vcmp.eq.s32.totalorder %v1281_v39, %v784_v12  ;;  %v1128_v51 = vsel %vm479_vm11, 1.0, %v1186_v48 }
 0x6a4   :  { %1110 = vst.msk [vmem:[%s2305_s3 + $0x10] sm:$0xff] %vm2320_vm0, %v1085_v43  ;;  %v805_v30 = vsel %vm801_vm6, %v1791_v52, 0.0  ;;  %v491_v5 = vmul.f32 2.0, %v1128_v51 }
 0x6a5   :  { %811 = vadd.xlane.f32.xlu0 %v805_v30 }
 0x6a6   :  { %v1927_v22 = vsub.f32 %v1881_v16, %v491_v5 }
 0x6a9   :  { %809 = vadd.xlane.f32.xlu2 %v804_v34 }
 0x6bb   :  { %v1885_v38 = vpop.xlane.xlu1 %477 }
 0x6be   :  { %v1883_v36 = vpop.xlane.xlu0 %475 }
 0x6bf   :  { %vm481_vm8 = vcmp.gt.f32.partialorder %v1883_v36, 1.5 }
 0x6c0   :  { %v1130_v42 = vsel %vm481_vm8, 1.0, %v1186_v48 }
 0x6c1   :  { %v493_v63 = vmul.f32 2.0, %v1130_v42 }
 0x6c3   :  { %v1965_v59 = vsub.f32 %v1883_v36, %v493_v63 }
 0x6cc   :  { %v794_v56 = vpop.xlane.xlu2 %793 }
 0x6cd   :  { %v795_v0 = vcvt.f32.s32 %v794_v56 }
 0x6cf   :  { %v798_v26 = vadd.s32 %v797_v45, %v795_v0 }
 0x6d1   :  { %v1086_v11 = vsel %vm2321_vm13, %v798_v26, %v1675_v17  ;;  %vm802_vm12 = vcmp.eq.s32.totalorder %v1281_v39, %v798_v26  ;;  %v1891_v17 = vpop.xlane.xlu1 %587 }
 0x6d2   :  { %1111 = vst.msk [vmem:[%s2305_s3 + $0x18] sm:$0xff] %vm2320_vm0, %v1086_v11  ;;  %v806_v52 = vsel %vm802_vm12, %v1784_v14, 0.0  ;;  %vm2323_vm1 = vcmp.gt.f32.partialorder %v1891_v17, 1.5  ;;  %vm2324_vm12 = vcmp.gt.f32.partialorder %v1885_v38, 1.5 }
 0x6d3   :  { %813 = vadd.xlane.f32.xlu1 %v806_v52  ;;  %v1134_v60 = vsel %vm2323_vm1, 1.0, %v1186_v48 }
 0x6d4   :  { %v605_v7 = vmul.f32 2.0, %v1134_v60 }
 0x6d6   :  { %v1955_v9 = vsub.f32 %v1891_v17, %v605_v7 }
 0x6d8   :  { %v841_v25 = vadd.f32 %v1955_v9, %v1965_v59 }
 0x6fc   :  { %v1887_v58 = vpop.xlane.xlu2 %473  ;;  %v1889_v31 = vpop.xlane.xlu0 %585 }
 0x6fd   :  { %v1905_v28 = vpop.xlane.xlu1 %697  ;;  %vm480_vm5 = vcmp.gt.f32.partialorder %v1887_v58, 1.5  ;;  %vm2327_vm2 = vcmp.gt.f32.partialorder %v1889_v31, 1.5 }
 0x6fe   :  { %v1129_v47 = vsel %vm480_vm5, 1.0, %v1186_v48  ;;  %v1133_v33 = vsel %vm2327_vm2, 1.0, %v1186_v48  ;;  %vm2322_vm7 = vcmp.gt.f32.partialorder %v1905_v28, 1.5 }
 0x6ff   :  { %v492_v2 = vmul.f32 2.0, %v1129_v47  ;;  %v604_v55 = vmul.f32 2.0, %v1133_v33  ;;  %v1137_v49 = vsel %vm2322_vm7, 1.0, %v1186_v48 }
 0x700   :  { %v716_v43 = vmul.f32 2.0, %v1137_v49 }
 0x701   :  { %v1981_v19 = vsub.f32 %v1887_v58, %v492_v2  ;;  %v1984_v10 = vsub.f32 %v1889_v31, %v604_v55 }
 0x702   :  { %v2012_v5 = vsub.f32 %v1905_v28, %v716_v43 }
 0x703   :  { %v840_v26 = vadd.f32 %v1984_v10, %v1981_v19 }
 0x704   :  { %v1893_v37 = vpop.xlane.xlu2 %583  ;;  %v1896_v41 = vpop.xlane.xlu0 %695 }
 0x705   :  { %vm591_vm9 = vcmp.gt.f32.partialorder %v1893_v37, 1.5  ;;  %vm2326_vm3 = vcmp.gt.f32.partialorder %v1896_v41, 1.5  ;;  %v844_v33 = vadd.f32 %v840_v26, %v2012_v5 }
 0x706   :  { %v1132_v14 = vsel %vm591_vm9, 1.0, %v1186_v48  ;;  %v1136_v46 = vsel %vm2326_vm3, 1.0, %v1186_v48 }
 0x707   :  { %v603_v15 = vmul.f32 2.0, %v1132_v14  ;;  %v715_v24 = vmul.f32 2.0, %v1136_v46 }
 0x709   :  { %v1919_v57 = vsub.f32 %v1893_v37, %v603_v15  ;;  %v1949_v35 = vsub.f32 %v1896_v41, %v715_v24 }
 0x70b   :  { %v839_v1 = vadd.f32 %v1919_v57, %v1927_v22 }
 0x70c   :  { %v1908_v4 = vpop.xlane.xlu2 %589  ;;  %v1921_v13 = vpop.xlane.xlu0 %701 }
 0x70d   :  { %v843_v34 = vadd.f32 %v839_v1, %v1949_v35  ;;  %vm2325_vm6 = vcmp.gt.f32.partialorder %v1908_v4, 1.5  ;;  %vm2329_vm7 = vcmp.gt.f32.partialorder %v1921_v13, 1.5 }
 0x713   :  { %v1931_v61 = vpop.xlane.xlu1 %807 }
 0x714   :  { %vm815_vm15 = vcmp.gt.f32.partialorder %v1931_v61, 1.5  ;;  %v1936_v20 = vpop.xlane.xlu2 %699 }
 0x715   :  { %v1140_v44 = vsel %vm815_vm15, 1.0, %v1186_v48  ;;  %vm705_vm4 = vcmp.gt.f32.partialorder %v1936_v20, 1.5 }
 0x716   :  { %v827_v21 = vmul.f32 2.0, %v1140_v44  ;;  %v1138_v6 = vsel %vm705_vm4, 1.0, %v1186_v48 }
 0x717   :  { %v717_v27 = vmul.f32 2.0, %v1138_v6 }
 0x718   :  { %v1960_v3 = vsub.f32 %v1931_v61, %v827_v21  ;;  %v1962_v29 = vpop.xlane.xlu0 %811 }
 0x719   :  { %v1968_v50 = vsub.f32 %v1936_v20, %v717_v27  ;;  %vm817_vm14 = vcmp.gt.f32.partialorder %v1962_v29, 1.5 }
 0x71a   :  { %v847_v8 = vadd.f32 %v843_v34, %v1960_v3  ;;  %v1142_v32 = vsel %vm817_vm14, 1.0, %v1186_v48 }
 0x71b   :  { %v829_v53 = vmul.f32 2.0, %v1142_v32  ;;  %v845_v18 = vadd.f32 %v841_v25, %v1968_v50 }
 0x71c   :  { %v1986_v40 = vmul.f32 0.25, %v847_v8  ;;  %v1988_v54 = vpop.xlane.xlu2 %809 }
 0x71d   :  { %v1992_v12 = vsub.f32 %v1962_v29, %v829_v53  ;;  %vm816_vm10 = vcmp.gt.f32.partialorder %v1988_v54, 1.5 }
 0x71e   :  { %v855_v30 = vsub.f32 %v1927_v22, %v1986_v40  ;;  %v867_v62 = vsub.f32 %v1919_v57, %v1986_v40  ;;  %v879_v56 = vsub.f32 %v1949_v35, %v1986_v40  ;;  %v1141_v0 = vsel %vm816_vm10, 1.0, %v1186_v48 }
 0x71f   :  { %v849_v45 = vadd.f32 %v845_v18, %v1992_v12  ;;  %v891_v14 = vsub.f32 %v1960_v3, %v1986_v40  ;;  %v828_v15 = vmul.f32 2.0, %v1141_v0 }
 0x720   :  { %v859_v11 = vmul.f32 %v855_v30, %v855_v30  ;;  %v871_v52 = vmul.f32 %v867_v62, %v867_v62  ;;  %v883_v60 = vmul.f32 %v879_v56, %v879_v56 }
 0x721   :  { %v2009_v51 = vmul.f32 0.25, %v849_v45  ;;  %v895_v1 = vmul.f32 %v891_v14, %v891_v14  ;;  %v2021_v47 = vsub.f32 %v1988_v54, %v828_v15 }
 0x722   :  { %v875_v46 = vadd.f32 %v871_v52, %v859_v11 }
 0x723   :  { %v857_v42 = vsub.f32 %v1965_v59, %v2009_v51  ;;  %v869_v24 = vsub.f32 %v1955_v9, %v2009_v51  ;;  %v881_v7 = vsub.f32 %v1968_v50, %v2009_v51  ;;  %v893_v6 = vsub.f32 %v1992_v12, %v2009_v51 }
 0x724   :  { %v887_v63 = vadd.f32 %v883_v60, %v875_v46  ;;  %v848_v2 = vadd.f32 %v844_v33, %v2021_v47 }
 0x725   :  { %v861_v44 = vmul.f32 %v857_v42, %v857_v42  ;;  %v873_v21 = vmul.f32 %v869_v24, %v869_v24  ;;  %v885_v34 = vmul.f32 %v881_v7, %v881_v7  ;;  %v897_v49 = vmul.f32 %v893_v6, %v893_v6 }
 0x726   :  { %v899_v27 = vadd.f32 %v895_v1, %v887_v63  ;;  %v2027_v32 = vmul.f32 0.25, %v848_v2  ;;  %v1135_v2 = vsel %vm2325_vm6, 1.0, %v1186_v48 }
 0x727   :  { %v877_v55 = vadd.f32 %v873_v21, %v861_v44 }
 0x728   :  { %v903_v8 = vmul.f32 0.33333334, %v899_v27  ;;  %v856_v18 = vsub.f32 %v1981_v19, %v2027_v32  ;;  %v868_v43 = vsub.f32 %v1984_v10, %v2027_v32  ;;  %v880_v30 = vsub.f32 %v2012_v5, %v2027_v32 }
 0x729   :  { %v889_v25 = vadd.f32 %v885_v34, %v877_v55  ;;  %v892_v0 = vsub.f32 %v2021_v47, %v2027_v32 }
 0x72a   :  { %1173 = vrsqrt.f32 %v903_v8  ;;  %v860_v56 = vmul.f32 %v856_v18, %v856_v18  ;;  %v872_v45 = vmul.f32 %v868_v43, %v868_v43  ;;  %v884_v52 = vmul.f32 %v880_v30, %v880_v30 }
 0x72b   :  { %v901_v53 = vadd.f32 %v897_v49, %v889_v25  ;;  %v896_v46 = vmul.f32 %v892_v0, %v892_v0  ;;  %vm914_vm0 = vcmp.eq.f32.partialorder %v903_v8, inf  ;;  %v917_v55 = vand.u32 2147483648, %v903_v8 }
 0x72c   :  { %v876_v11 = vadd.f32 %v872_v45, %v860_v56  ;;  %v1131_v25 = vsel %vm2324_vm12, 1.0, %v1186_v48  ;;  %vm916_vm13 = vcmp.eq.f32.partialorder %v903_v8, 0.0  ;;  %v606_v56 = vmul.f32 2.0, %v1135_v2 }
 0x72d   :  { %v905_v62 = vmul.f32 0.33333334, %v901_v53  ;;  %v2051_v53 = vld [vmem:[%s2306_s2] sm:$0xff] }
 0x72e   :  { %v888_v15 = vadd.f32 %v884_v52, %v876_v11  ;;  %vm28_vm1 = vcmp.gt.f32.partialorder %v2051_v53, 0.5  ;;  %v27_v53 = vld [vmem:[%s2306_s2 + $0x18] sm:$0xff] }
 0x72f   :  { %1175 = vrsqrt.f32 %v905_v62  ;;  %vm940_vm3 = vcmp.eq.f32.partialorder %v905_v62, 0.0 }
 0x730   :  { %v1174_v26 = vpop.eup %1173  ;;  %v900_v42 = vadd.f32 %v896_v46, %v888_v15  ;;  %v2073_v46 = vsub.f32 %v1908_v4, %v606_v56 }
 0x731   :  { %v908_v14 = vmul.f32 %v1174_v26, %v903_v8 }
 0x732   :  { %v2037_v1 = vmul.f32 0.33333334, %v900_v42 }
 0x733   :  { %v909_v60 = vmul.f32 %v1174_v26, %v908_v14 }
 0x734   :  { %1177 = vrsqrt.f32 %v2037_v1 }
 0x735   :  { %v1176_v24 = vpop.eup %1175  ;;  %v910_v7 = vmul.f32 0.5, %v909_v60 }
 0x736   :  { %v932_v63 = vmul.f32 %v1176_v24, %v905_v62 }
 0x737   :  { %v911_v33 = vsub.f32 1.5, %v910_v7 }
 0x738   :  { %v933_v44 = vmul.f32 %v1176_v24, %v932_v63 }
 0x739   :  { %v912_v21 = vmul.f32 %v1174_v26, %v911_v33  ;;  %v494_v26 = vmul.f32 2.0, %v1131_v25 }
 0x73a   :  { %v934_v6 = vmul.f32 0.5, %v933_v44  ;;  %v1178_v18 = vpop.eup %1177  ;;  %v929_v44 = vand.u32 2147483648, %v2037_v1 }
 0x73b   :  { %v913_v27 = vmul.f32 %v912_v21, %v903_v8  ;;  %v920_v0 = vmul.f32 %v1178_v18, %v2037_v1 }
 0x73c   :  { %v935_v34 = vsub.f32 1.5, %v934_v6 }
 0x73d   :  { %v915_v49 = vsel %vm914_vm0, %v903_v8, %v913_v27  ;;  %vm938_vm0 = vcmp.eq.f32.partialorder %v905_v62, inf  ;;  %v941_v8 = vand.u32 2147483648, %v905_v62  ;;  %v921_v52 = vmul.f32 %v1178_v18, %v920_v0  ;;  %v2142_v27 = vld [vmem:[%s2306_s2 + $0x8] sm:$0xff] }
 0x73e   :  { %v918_v43 = vsel %vm916_vm13, %v917_v55, %v915_v49  ;;  %v936_v30 = vmul.f32 %v1176_v24, %v935_v34 }
 0x73f   :  { %v2055_v45 = vadd.f32 %v918_v43, %v1986_v40  ;;  %v1139_v40 = vsel %vm2329_vm7, 1.0, %v1186_v48  ;;  %v922_v60 = vmul.f32 0.5, %v921_v52 }
 0x740   :  { %v937_v11 = vmul.f32 %v936_v30, %v905_v62  ;;  %v718_v42 = vmul.f32 2.0, %v1139_v40 }
 0x741   :  { %vm1071_vm12 = vcmp.ge.f32.partialorder %v1960_v3, %v2055_v45  ;;  %vm960_vm13 = vcmp.ge.f32.partialorder %v1927_v22, %v2055_v45  ;;  %v2080_v22 = vld [vmem:[%s2306_s2 + $0x10] sm:$0xff]  ;;  %v923_v16 = vsub.f32 1.5, %v922_v60  ;;  %vm1034_vm7 = vcmp.ge.f32.partialorder %v1949_v35, %v2055_v45 }
 0x742   :  { %vm2068_vm6 = vmand %vm1071_vm12, %vm815_vm15  ;;  %v939_v15 = vsel %vm938_vm0, %v905_v62, %v937_v11  ;;  %vm997_vm15 = vcmp.ge.f32.partialorder %v1919_v57, %v2055_v45  ;;  %v2090_v62 = vsub.f32 %v1885_v38, %v494_v26 }
 0x743   :  { %v942_v3 = vsel %vm940_vm3, %v941_v8, %v939_v15  ;;  %vm964_vm2 = vmand %vm960_vm13, %vm479_vm11  ;;  %vm2328_vm3 = vcmp.gt.f32.partialorder %v2080_v22, 0.5  ;;  %v924_v63 = vmul.f32 %v1178_v18, %v923_v16 }
 0x744   :  { %v2085_v61 = vadd.f32 %v942_v3, %v2009_v51  ;;  %vm968_vm12 = vmand %vm964_vm2, %vm28_vm1  ;;  %v842_v51 = vadd.f32 %v2073_v46, %v2090_v62 }
 0x745   :  { %v976_v24 = vsel %vm968_vm12, 1, %v2344_v23  ;;  %vm2102_vm2 = vmand %vm997_vm15, %vm591_vm9  ;;  %v925_v33 = vmul.f32 %v924_v63, %v2037_v1 }
 0x746   :  { %vm1073_vm11 = vcmp.ge.f32.partialorder %v1992_v12, %v2085_v61  ;;  %981 = vperm.xlu2 %1164, %v976_v24   ;;  %v2095_v7 = vpop.xlane.xlu1 %813  ;;  %vm962_vm0 = vcmp.ge.f32.partialorder %v1965_v59, %v2085_v61  ;;  %v2121_v59 = vsub.f32 %v1921_v13, %v718_v42  ;;  %vm1036_vm15 = vcmp.ge.f32.partialorder %v1968_v50, %v2085_v61 }
 0x747   :  { %vm2110_vm13 = vmand %vm1073_vm11, %vm817_vm14  ;;  %vm818_vm12 = vcmp.gt.f32.partialorder %v2095_v7, 1.5  ;;  %vm926_vm11 = vcmp.eq.f32.partialorder %v2037_v1, inf  ;;  %v2366_v24 = vmov 0 }
 0x748   :  { %v1143_v37 = vsel %vm818_vm12, 1.0, %v1186_v48  ;;  %vm966_vm9 = vmand %vm962_vm0, %vm481_vm8  ;;  %v846_v36 = vadd.f32 %v842_v51, %v2121_v59  ;;  %v927_v21 = vsel %vm926_vm11, %v2037_v1, %v925_v33  ;;  %vm928_vm0 = vcmp.eq.f32.partialorder %v2037_v1, 0.0 }
 0x749   :  { %v830_v29 = vmul.f32 2.0, %v1143_v37  ;;  %vm970_vm14 = vmand %vm966_vm9, %vm2328_vm3  ;;  %v930_v50 = vsel %vm928_vm0, %v929_v44, %v927_v21 }
 0x74a   :  { %v978_v48 = vsel %vm970_vm14, 1, %v2344_v23  ;;  %vm1005_vm8 = vmand %vm2102_vm2, %vm28_vm1  ;;  %v2151_v55 = vadd.f32 %v930_v50, %v2027_v32  ;;  %vm2330_vm14 = vcmp.gt.f32.partialorder %v2142_v27, 0.5 }
 0x74b   :  { %v834_v6 = vsub.f32 %v2095_v7, %v830_v29  ;;  %987 = vperm.xlu1 %1163, %v978_v48   ;;  %vm2146_vm9 = vmand %vm1036_vm15, %vm705_vm4  ;;  %v1013_v1 = vsel %vm1005_vm8, 1, %v2344_v23 }
 0x74c   :  { %vm1072_vm2 = vcmp.ge.f32.partialorder %v2021_v47, %v2151_v55  ;;  %vm961_vm11 = vcmp.ge.f32.partialorder %v1981_v19, %v2151_v55  ;;  %vm998_vm15 = vcmp.ge.f32.partialorder %v1984_v10, %v2151_v55 }
 0x74d   :  { %v850_v34 = vadd.f32 %v846_v36, %v834_v6  ;;  %vm2161_vm4 = vmand %vm1072_vm2, %vm816_vm10  ;;  %vm2362_vm10 = vcmp.gt.f32.partialorder %v1889_v31, 1.5 }
 0x74e   :  { %1018 = vperm.xlu2 %1164, %v1013_v1   ;;  %vm965_vm8 = vmand %vm961_vm11, %vm480_vm5  ;;  %vm2363_vm5 = vcmp.gt.f32.partialorder %v1896_v41, 1.5 }
 0x74f   :  { %v854_v25 = vmul.f32 0.25, %v850_v34  ;;  %vm969_vm0 = vmand %vm965_vm8, %vm2330_vm14 }
 0x750   :  { %vm1002_vm2 = vmand %vm998_vm15, %vm2362_vm10  ;;  %v977_v10 = vsel %vm969_vm0, 1, %v2344_v23 }
 0x751   :  { %v858_v32 = vsub.f32 %v2090_v62, %v854_v25  ;;  %v870_v49 = vsub.f32 %v2073_v46, %v854_v25  ;;  %v882_v47 = vsub.f32 %v2121_v59, %v854_v25  ;;  %v894_v18 = vsub.f32 %v834_v6, %v854_v25  ;;  %vm1006_vm3 = vmand %vm1002_vm2, %vm2330_vm14  ;;  %984 = vperm.xlu0 %1157, %v977_v10  }
 0x752   :  { %v1014_v30 = vsel %vm1006_vm3, 1, %v2344_v23  ;;  %vm1038_vm11 = vmand %vm1034_vm7, %vm2363_vm5  ;;  %vm31_vm3 = vcmp.gt.f32.partialorder %v27_v53, 0.5  ;;  %vm2368_vm5 = vcmp.gt.f32.partialorder %v1908_v4, 1.5 }
 0x753   :  { %v862_v19 = vmul.f32 %v858_v32, %v858_v32  ;;  %v874_v54 = vmul.f32 %v870_v49, %v870_v49  ;;  %v886_v58 = vmul.f32 %v882_v47, %v882_v47  ;;  %1021 = vperm.xlu1 %1163, %v1014_v30   ;;  %v898_v0 = vmul.f32 %v894_v18, %v894_v18  ;;  %vm2188_vm15 = vmand %vm2068_vm6, %vm28_vm1 }
 0x754   :  { %vm1042_vm8 = vmand %vm1038_vm11, %vm28_vm1 }
 0x755   :  { %v878_v43 = vadd.f32 %v874_v54, %v862_v19  ;;  %v1050_v45 = vsel %vm1042_vm8, 1, %v2344_v23 }
 0x757   :  { %v890_v56 = vadd.f32 %v886_v58, %v878_v43 }
 0x759   :  { %v902_v31 = vadd.f32 %v898_v0, %v890_v56 }
 0x75b   :  { %v906_v35 = vmul.f32 0.33333334, %v902_v31  ;;  %1055 = vperm.xlu1 %1163, %v1050_v45  }
 0x75d   :  { %1179 = vrsqrt.f32 %v906_v35  ;;  %vm950_vm7 = vcmp.eq.f32.partialorder %v906_v35, inf  ;;  %v953_v14 = vand.u32 2147483648, %v906_v35  ;;  %vm952_vm6 = vcmp.eq.f32.partialorder %v906_v35, 0.0 }
 0x763   :  { %v1180_v11 = vpop.eup %1179 }
 0x764   :  { %v944_v41 = vmul.f32 %v1180_v11, %v906_v35 }
 0x766   :  { %v945_v8 = vmul.f32 %v1180_v11, %v944_v41 }
 0x768   :  { %v946_v52 = vmul.f32 0.5, %v945_v8 }
 0x76a   :  { %v947_v40 = vsub.f32 1.5, %v946_v52 }
 0x76c   :  { %v948_v15 = vmul.f32 %v1180_v11, %v947_v40 }
 0x76e   :  { %v949_v3 = vmul.f32 %v948_v15, %v906_v35 }
 0x770   :  { %v951_v60 = vsel %vm950_vm7, %v906_v35, %v949_v3 }
 0x771   :  { %v954_v42 = vsel %vm952_vm6, %v953_v14, %v951_v60  ;;  %vm2369_vm6 = vcmp.gt.f32.partialorder %v1885_v38, 1.5 }
 0x772   :  { %v958_v16 = vadd.f32 %v954_v42, %v854_v25 }
 0x774   :  { %vm1074_vm1 = vcmp.ge.f32.partialorder %v834_v6, %v958_v16  ;;  %vm1000_vm0 = vcmp.ge.f32.partialorder %v2073_v46, %v958_v16  ;;  %vm963_vm2 = vcmp.ge.f32.partialorder %v2090_v62, %v958_v16  ;;  %vm1037_vm7 = vcmp.ge.f32.partialorder %v2121_v59, %v958_v16 }
 0x775   :  { %vm2201_vm10 = vmand %vm1074_vm1, %vm818_vm12  ;;  %vm999_vm1 = vcmp.ge.f32.partialorder %v1955_v9, %v2085_v61 }
 0x776   :  { %v2367_v24 = vsel %vm2201_vm10, 4294967295, %v2366_v24  ;;  %vm1004_vm11 = vmand %vm1000_vm0, %vm2368_vm5  ;;  %vm2370_vm10 = vcmp.gt.f32.partialorder %v1921_v13, 1.5 }
 0x777   :  { %vm1008_vm8 = vmand %vm1004_vm11, %vm31_vm3  ;;  %vm2371_vm11 = vcmp.gt.f32.partialorder %v1891_v17, 1.5 }
 0x778   :  { %v1016_v57 = vsel %vm1008_vm8, 1, %v2344_v23  ;;  %vm967_vm14 = vmand %vm963_vm2, %vm2369_vm6  ;;  %vm2372_vm2 = vcmp.gt.f32.partialorder %v2080_v22, 0.5 }
 0x779   :  { %1027 = vperm.xlu2 %1164, %v1016_v57   ;;  %vm971_vm12 = vmand %vm967_vm14, %vm31_vm3 }
 0x77a   :  { %v979_v46 = vsel %vm971_vm12, 1, %v2344_v23  ;;  %vm1041_vm0 = vmand %vm1037_vm7, %vm2370_vm10 }
 0x77b   :  { %990 = vperm.xlu0 %1157, %v979_v46   ;;  %vm1045_vm5 = vmand %vm1041_vm0, %vm31_vm3 }
 0x77c   :  { %v1053_v4 = vsel %vm1045_vm5, 1, %v2344_v23  ;;  %vm1003_vm8 = vmand %vm999_vm1, %vm2371_vm11  ;;  %vm1035_vm1 = vcmp.ge.f32.partialorder %v2012_v5, %v2151_v55  ;;  %vm2376_vm5 = vcmp.gt.f32.partialorder %v2142_v27, 0.5 }
 0x77d   :  { %1064 = vperm.xlu1 %1163, %v1053_v4   ;;  %vm1044_vm14 = vmand %vm2146_vm9, %vm2372_vm2  ;;  %vm2375_vm9 = vcmp.gt.f32.partialorder %v1905_v28, 1.5  ;;  %v1087_v28 = vsel %vm2188_vm15, 1, %v2344_v23  ;;  %vm2380_vm15 = vcmp.eq.s32.totalorder %v1281_v39, 1 }
 0x77e   :  { %vm2373_vm6 = vmmov %vm2372_vm2  ;;  %v1052_v38 = vsel %vm1044_vm14, 1, %v2344_v23 }
 0x77f   :  { %vm1007_vm12 = vmand %vm1003_vm8, %vm2373_vm6  ;;  %vm2382_vm6 = vcmp.eq.s32.totalorder %v1281_v39, 3 }
 0x780   :  { %vm2374_vm10 = vmmov %vm2372_vm2  ;;  %v1015_v17 = vsel %vm1007_vm12, 1, %v2344_v23  ;;  %vm2378_vm2 = vnez %v2367_v24  ;;  %vm2383_vm12 = vcmask 31744  }
 0x781   :  { %1061 = vperm.xlu2 %1164, %v1052_v38   ;;  %vm1081_vm7 = vmand %vm2110_vm13, %vm2374_vm10 }
 0x782   :  { %v1089_v13 = vsel %vm1081_vm7, 1, %v2344_v23  ;;  %vm1039_vm0 = vmand %vm1035_vm1, %vm2375_vm9 }
 0x783   :  { %1024 = vperm.xlu0 %1157, %v1015_v17   ;;  %vm1080_vm11 = vmand %vm2161_vm4, %vm2376_vm5  ;;  %vm2379_vm4 = vcmp.eq.s32.totalorder %v1281_v39, 0 }
 0x784   :  { %vm2377_vm8 = vmmov %vm2376_vm5  ;;  %v1088_v9 = vsel %vm1080_vm11, 1, %v2344_v23 }
 0x785   :  { %1098 = vperm.xlu1 %1163, %v1089_v13   ;;  %vm1043_vm13 = vmand %vm1039_vm0, %vm2377_vm8 }
 0x786   :  { %v1051_v5 = vsel %vm1043_vm13, 1, %v2344_v23  ;;  %vm1082_vm14 = vmand %vm2378_vm2, %vm31_vm3  ;;  %vm2381_vm3 = vcmp.eq.s32.totalorder %v1281_v39, 2 }
 0x787   :  { %v1090_v22 = vsel %vm1082_vm14, 1, %v2344_v23  ;;  %vm2384_vm10 = vmmov %vm2379_vm4 }
 0x788   :  { %vm2385_vm7 = vmmov %vm2380_vm15 }
 0x789   :  { %1095 = vperm.xlu2 %1164, %v1088_v9   ;;  %vm2386_vm1 = vmmov %vm2381_vm3 }
 0x78a   :  { %vm2387_vm9 = vmmov %vm2382_vm6 }
 0x78b   :  { %1058 = vperm.xlu0 %1157, %v1051_v5   ;;  %vm2388_vm0 = vmmov %vm2383_vm12 }
 0x78c   :  { %vm2389_vm5 = vmmov %vm2379_vm4 }
 0x78d   :  { %vm2390_vm11 = vmmov %vm2385_vm7 }
 0x78e   :  { %vm2391_vm8 = vmmov %vm2386_vm1 }
 0x78f   :  { %vm2392_vm13 = vmmov %vm2382_vm6 }
 0x790   :  { %vm2393_vm2 = vmmov %vm2379_vm4 }
 0x791   :  { %vm2394_vm14 = vmmov %vm2388_vm0 }
 0x793   :  { %1092 = vperm.xlu0 %1157, %v1087_v28  }
 0x79b   :  { %1101 = vperm.xlu0 %1157, %v1090_v22  }
 0x7a0   :  { %v982_v62 = vpop.permute.xlu2 %981 }
 0x7a1   :  { %v992_v25 = vsel %vm2389_vm5, %v982_v62, 0 }
 0x7a8   :  { %v1019_v51 = vpop.permute.xlu2 %1018 }
 0x7a9   :  { %v1029_v20 = vsel %vm2390_vm11, %v1019_v51, %v992_v25 }
 0x7bd   :  { %v988_v61 = vpop.permute.xlu1 %987 }
 0x7be   :  { %v994_v44 = vsel %vm2379_vm4, %v988_v61, 0  ;;  %vm2395_vm4 = vmmov %vm2385_vm7 }
 0x7c3   :  { %v985_v12 = vpop.permute.xlu0 %984 }
 0x7c4   :  { %v993_v50 = vsel %vm2384_vm10, %v985_v12, 0 }
 0x7c5   :  { %v1022_v7 = vpop.permute.xlu1 %1021 }
 0x7c6   :  { %v1030_v27 = vsel %vm2385_vm7, %v1022_v7, %v993_v50 }
 0x7cd   :  { %v1056_v63 = vpop.permute.xlu1 %1055 }
 0x7ce   :  { %v1066_v32 = vsel %vm2391_vm8, %v1056_v63, %v1029_v20 }
 0x7d3   :  { %v1028_v37 = vpop.permute.xlu2 %1027 }
 0x7db   :  { %v1062_v29 = vpop.permute.xlu2 %1061 }
 0x7e3   :  { %v1096_v55 = vpop.permute.xlu2 %1095 }
 0x7ed   :  { %v991_v59 = vpop.permute.xlu0 %990 }
 0x7ee   :  { %v995_v19 = vsel %vm2393_vm2, %v991_v59, 0 }
 0x7ef   :  { %v1065_v33 = vpop.permute.xlu1 %1064  ;;  %v1032_v54 = vsel %vm2395_vm4, %v1028_v37, %v995_v19 }
 0x7f5   :  { %v1025_v48 = vpop.permute.xlu0 %1024 }
 0x7f6   :  { %v1031_v36 = vsel %vm2380_vm15, %v1025_v48, %v994_v44  ;;  %vm2396_vm15 = vmmov %vm2386_vm1 }
 0x7f7   :  { %v1099_v21 = vpop.permute.xlu1 %1098  ;;  %v1068_v23 = vsel %vm2381_vm3, %v1062_v29, %v1031_v36  ;;  %v1069_v18 = vsel %vm2396_vm15, %v1065_v33, %v1032_v54  ;;  %vm2397_vm3 = vmmov %vm2382_vm6 }
 0x7f8   :  { %v1105_v6 = vsel %vm2382_vm6, %v1099_v21, %v1068_v23  ;;  %vm2398_vm6 = vmmov %vm2388_vm0 }
 0x7f9   :  { %1114 = vst.msk [vmem:[%s2307_s4 + $0x10] sm:$0xff] %vm2383_vm12, %v1105_v6 }
 0x7fd   :  { %v1059_v2 = vpop.permute.xlu0 %1058 }
 0x7fe   :  { %v1067_v34 = vsel %vm2386_vm1, %v1059_v2, %v1030_v27 }
 0x7ff   :  { %v1104_v1 = vsel %vm2387_vm9, %v1096_v55, %v1067_v34 }
 0x800   :  { %1113 = vst.msk [vmem:[%s2307_s4 + $0x8] sm:$0xff] %vm2388_vm0, %v1104_v1 }
 0x805   :  { %v1093_v49 = vpop.permute.xlu0 %1092 }
 0x806   :  { %v1103_v47 = vsel %vm2392_vm13, %v1093_v49, %v1066_v32 }
 0x807   :  { %1112 = vst.msk [vmem:[%s2307_s4] sm:$0xff] %vm2394_vm14, %v1103_v47 }
 0x80d   :  { %v1102_v10 = vpop.permute.xlu0 %1101 }
 0x80e   :  { %v1106_v43 = vsel %vm2397_vm3, %v1102_v10, %v1069_v18 }
 0x80f   :  { %1115 = vst.msk [vmem:[%s2307_s4 + $0x18] sm:$0xff] %vm2398_vm6, %v1106_v43 }

</bundles_post_ra>
